<compile_context>
chip_gen: v7x
topology: tpu7x:2x2x1
jax: 0.10.0
libtpu: 0.0.40
codegen_flags: <defaults>
</compile_context>

<pallas_src>
import functools
import numpy as np
import jax
import jax.numpy as jnp
from jax.experimental import pallas as pl
from jax.experimental.pallas import tpu as pltpu


# ----------------------------------------------------------------------------
# 1-D linear interpolation matrix (align_corners=True), out = U @ in
# ----------------------------------------------------------------------------
def _interp_matrix_1d(out_size, in_size):
    U = np.zeros((out_size, in_size), dtype=np.float32)
    if in_size == 1 or out_size == 1:
        U[:, 0] = 1.0
        return U
    scale = (in_size - 1) / (out_size - 1)
    for o in range(out_size):
        src = o * scale
        i0 = min(int(np.floor(src)), in_size - 1)
        i1 = min(i0 + 1, in_size - 1)
        w1 = src - i0
        U[o, i0] += 1.0 - w1
        U[o, i1] += w1
    return U


# ----------------------------------------------------------------------------
# Kernel 1: attention path + fused W 1x1 conv + per-batch BN statistics.
#   x       : (C, H*W)         f32   lane-dense slab for y / W-conv / stats
#   x_patch : (C*sh*sw, Ho*Wo) bf16  patch layout for the strided theta conv
#   g       : (Cg*Hg, Wg)      bf16  folded layout for the separable phi upsample
# ----------------------------------------------------------------------------
def _attention_kernel(x_ref, xp_ref, g_ref,
                      wt_ref, phi_big_ref, phi_b_ref, ugw_t_ref, ugh_hf_ref,
                      psi_pool_ref, psi_b_ref, uxw_t_ref, uhb_ref,
                      ww_ref, wb_ref,
                      sig_ref, wy_ref, stats_ref,
                      *, ho_n, wo_n, h_n, inv_hw):
    f32 = jnp.float32
    bf16 = jnp.bfloat16

    # --- theta: exact strided (sh,sw) conv as one bf16 matmul on the patch slab
    theta = jnp.dot(wt_ref[...], xp_ref[...],
                    preferred_element_type=f32)                        # (F, Ho*Wo)

    # --- phi: 1x1 conv on folded g + separable bilinear upsample; the
    #     H-direction matrix lands directly in the (ho-major, f) fold.
    phi = jnp.dot(phi_big_ref[...], g_ref[...],
                  preferred_element_type=f32) + phi_b_ref[...]          # (F*Hg, Wg)
    phi_wu = jnp.dot(phi.astype(bf16), ugw_t_ref[...],
                     preferred_element_type=f32)                        # (F*Hg, Wo)
    phi_up = jnp.dot(ugh_hf_ref[...], phi_wu.astype(bf16),
                     preferred_element_type=f32)                        # (Ho*F, Wo)

    # --- bring theta into the same (ho, f)-major fold (Ho tiny lane slices)
    theta_fold = jnp.concatenate(
        [theta[:, i * wo_n:(i + 1) * wo_n] for i in range(ho_n)],
        axis=0)                                                         # (Ho*F, Wo)

    # --- f = relu(theta + phi); psi as one pooling matmul; exact sigmoid
    f_act = jnp.maximum(theta_fold + phi_up, 0.0)
    psi = jnp.dot(psi_pool_ref[...], f_act.astype(bf16),
                  preferred_element_type=f32) + psi_b_ref[...]          # (Ho, Wo)
    sigm = pl.reciprocal(1.0 + jnp.exp(-psi), approx=False)

    # --- separable upsample of the attention map straight into flat (1, H*W):
    #     W-direction via MXU, H-direction via constant mask + sublane reduce.
    s_w = jnp.dot(sigm.astype(bf16), uxw_t_ref[...],
                  preferred_element_type=f32)                           # (Ho, W)
    s_w_t = jnp.concatenate([s_w] * h_n, axis=1)                        # (Ho, H*W)
    sig_flat = jnp.sum(uhb_ref[...] * s_w_t, axis=0, keepdims=True)     # (1, H*W)
    sig_ref[...] = sig_flat

    # --- y = sigm*x ; exact (C,C) W-conv on the lane-dense slab ; BN statistics
    y = x_ref[...] * sig_flat                                           # (C, H*W)
    wy = jnp.dot(ww_ref[...], y.astype(bf16),
                 preferred_element_type=f32) + wb_ref[...]              # (C, H*W) f32
    wy_ref[...] = wy.astype(wy_ref.dtype)                               # bf16 store
    mu = jnp.sum(wy, axis=1, keepdims=True) * inv_hw                    # (C, 1)
    cen = wy - mu
    ss = jnp.sum(cen * cen, axis=1, keepdims=True)                      # (C, 1)
    stats_ref[...] = jnp.concatenate([mu, ss], axis=1)                  # (C, 2)


# ----------------------------------------------------------------------------
# Kernel 2: BN normalize only (per-channel scale/shift), lane-dense (C, H*W)
# ----------------------------------------------------------------------------
def _bn_scale_kernel(wy_ref, scale_ref, shift_ref, out_ref):
    out_ref[...] = (wy_ref[...].astype(jnp.float32) * scale_ref[...]
                    + shift_ref[...])


# ----------------------------------------------------------------------------
# Wrapper
# ----------------------------------------------------------------------------
def grid_attention_forward(x, g, params, sub_sample_factor=(2, 2)):
    N, C, H, W = x.shape
    Ng, Cg, Hg, Wg = g.shape
    assert N == Ng
    sh, sw = sub_sample_factor
    assert H % sh == 0 and W % sw == 0
    Ho, Wo = H // sh, W // sw
    HW, So = H * W, Ho * Wo
    F_ = params["theta_w"].shape[0]
    CKK, FHg, CgHg, HoF = C * sh * sw, F_ * Hg, Cg * Hg, Ho * F_
    f32np = np.float32
    bf16 = jnp.bfloat16

    # ---------------- host-side operator construction (tiny constants) --------
    theta_w = np.asarray(params["theta_w"], f32np).reshape(F_, CKK)
    phi_w = np.asarray(params["phi_w"], f32np).reshape(F_, Cg)
    phi_b = np.asarray(params["phi_b"], f32np)
    psi_w = np.asarray(params["psi_w"], f32np).reshape(F_)
    psi_b = np.asarray(params["psi_b"], f32np).reshape(1, 1)
    w_w = np.asarray(params["w_w"], f32np).reshape(C, C)
    w_b = np.asarray(params["w_b"], f32np).reshape(C, 1)

    phi_big = np.kron(phi_w, np.eye(Hg, dtype=f32np))                  # (F*Hg, Cg*Hg)
    phi_b_big = np.repeat(phi_b, Hg).reshape(FHg, 1).astype(f32np)

    ugh = _interp_matrix_1d(Ho, Hg)                                    # (Ho, Hg)
    ugw_t = _interp_matrix_1d(Wo, Wg).T                                # (Wg, Wo)
    uxh = _interp_matrix_1d(H, Ho)                                     # (H, Ho)
    uxw_t = _interp_matrix_1d(W, Wo).T                                 # (Wo, W)

    # H-direction phi upsample mapping (f, hg)-rows -> (ho, f)-rows (ho-major)
    ugh_hf = np.zeros((HoF, FHg), f32np)
    for ho in range(Ho):
        for f in range(F_):
            ugh_hf[ho * F_ + f, f * Hg:(f + 1) * Hg] = ugh[ho]

    # psi as a single pooling matmul over the (ho, f) fold
    psi_pool = np.kron(np.eye(Ho, dtype=f32np), psi_w.reshape(1, F_))  # (Ho, Ho*F)

    # H-direction of the final upsample as a constant mask for a sublane reduce
    uhb = np.repeat(uxh.T, W, axis=1).astype(f32np)                    # (Ho, H*W)

    # ---------------- device-side input layouts -------------------------------
    x_flat = x.reshape(N, C, HW)                                       # free reshape
    x_patch = jnp.transpose(x.reshape(N, C, Ho, sh, Wo, sw),
                            (0, 1, 3, 5, 2, 4)).reshape(N, CKK, So).astype(bf16)
    g_fold = g.reshape(N, CgHg, Wg).astype(bf16)

    kernel = functools.partial(_attention_kernel, ho_n=Ho, wo_n=Wo, h_n=H,
                               inv_hw=1.0 / HW)

    flops = 2 * N * (F_ * CKK * So + FHg * CgHg * Wg + FHg * Wg * Wo
                     + HoF * FHg * Wo + Ho * HoF * Wo + Ho * Wo * W
                     + Ho * HW + C * C * HW + C * HW)
    per_batch_bytes = (4 * C * HW + 2 * CKK * So + 2 * CgHg * Wg
                       + 4 * HW + 2 * C * HW + 8 * C)
    const_bytes = (2 * (F_ * CKK + FHg * CgHg + Wg * Wo + HoF * FHg
                        + Ho * HoF + Wo * W + C * C)
                   + 4 * (FHg + 1 + Ho * HW + C))
    bytes_accessed = N * per_batch_bytes + const_bytes

    out_shape = (jax.ShapeDtypeStruct((N, 1, HW), jnp.float32),
                 jax.ShapeDtypeStruct((N, C, HW), jnp.bfloat16),
                 jax.ShapeDtypeStruct((N, C, 2), jnp.float32))
    out_specs = (pl.BlockSpec((None, 1, HW), lambda n: (n, 0, 0)),
                 pl.BlockSpec((None, C, HW), lambda n: (n, 0, 0)),
                 pl.BlockSpec((None, C, 2), lambda n: (n, 0, 0)))

    args = (x_flat, x_patch, g_fold,
            jnp.asarray(theta_w, bf16), jnp.asarray(phi_big, bf16),
            jnp.asarray(phi_b_big), jnp.asarray(ugw_t, bf16),
            jnp.asarray(ugh_hf, bf16), jnp.asarray(psi_pool, bf16),
            jnp.asarray(psi_b), jnp.asarray(uxw_t, bf16),
            jnp.asarray(uhb), jnp.asarray(w_w, bf16), jnp.asarray(w_b))

    def make_in_specs(buffered):
        def const(shape):
            idx = lambda n: (0,) * len(shape)
            if buffered:
                return pl.BlockSpec(shape, idx, pipeline_mode=pl.Buffered(1))
            return pl.BlockSpec(shape, idx)
        return [
            pl.BlockSpec((None, C, HW), lambda n: (n, 0, 0)),          # x_flat
            pl.BlockSpec((None, CKK, So), lambda n: (n, 0, 0)),        # x_patch
            pl.BlockSpec((None, CgHg, Wg), lambda n: (n, 0, 0)),       # g_fold
            const((F_, CKK)),      # theta weights (flat)
            const((FHg, CgHg)),    # phi 1x1 (folded)
            const((FHg, 1)),       # phi bias
            const((Wg, Wo)),       # g upsample, W direction
            const((HoF, FHg)),     # g upsample, H direction -> ho-major fold
            const((Ho, HoF)),      # psi pooling matmul
            const((1, 1)),         # psi bias
            const((Wo, W)),        # x upsample, W direction
            const((Ho, HW)),       # x upsample, H direction mask (sublane reduce)
            const((C, C)),         # W 1x1 conv weights
            const((C, 1)),         # W conv bias
        ]

    def run(in_specs):
        return pl.pallas_call(
            kernel,
            out_shape=out_shape,
            grid=(N,),
            in_specs=in_specs,
            out_specs=out_specs,
            compiler_params=pltpu.CompilerParams(
                dimension_semantics=("parallel",),
                vmem_limit_bytes=32 * 1024 * 1024),   # fits v7x's 64 MiB with margin
            cost_estimate=pl.CostEstimate(flops=int(flops),
                                          transcendentals=int(N * So),
                                          bytes_accessed=int(bytes_accessed)),
        )(*args)

    try:
        # single-buffer the constant operands (they never change across the grid)
        sig_o, wy_o, stats_o = run(make_in_specs(buffered=True))
    except Exception:
        # TODO(synk): this JAX build rejects pipeline_mode=pl.Buffered(1); fall
        #   back to default double-buffered constants.
        sig_o, wy_o, stats_o = run(make_in_specs(buffered=False))

    # ---- numerically-stable combine of per-batch BN statistics (size C) ----
    # (valid because every grid step covers exactly H*W elements per channel)
    mu_n = stats_o[:, :, 0]                                            # (N, C)
    ss_n = stats_o[:, :, 1]                                            # (N, C)
    mu = jnp.mean(mu_n, axis=0)                                        # (C,)
    var = jnp.mean(ss_n, axis=0) / HW + jnp.mean((mu_n - mu) ** 2, axis=0)
    inv = jax.lax.rsqrt(var + 1e-5)
    scale = params["bn_gamma"].reshape(C) * inv
    shift = params["bn_beta"].reshape(C) - mu * scale

    # ---- kernel 2: BN scale/shift on lane-dense (C, H*W) blocks (bf16 in) ----
    wy_bn = pl.pallas_call(
        _bn_scale_kernel,
        out_shape=jax.ShapeDtypeStruct((N, C, HW), jnp.float32),
        grid=(N,),
        in_specs=[pl.BlockSpec((None, C, HW), lambda n: (n, 0, 0)),
                  pl.BlockSpec((C, 1), lambda n: (0, 0)),
                  pl.BlockSpec((C, 1), lambda n: (0, 0))],
        out_specs=pl.BlockSpec((None, C, HW), lambda n: (n, 0, 0)),
        compiler_params=pltpu.CompilerParams(
            dimension_semantics=("parallel",),
            vmem_limit_bytes=32 * 1024 * 1024),
    )(wy_o, scale.reshape(C, 1).astype(jnp.float32),
      shift.reshape(C, 1).astype(jnp.float32))

    W_y = wy_bn.reshape(N, C, H, W)
    sigm_psi_f = sig_o.reshape(N, 1, H, W)
    return W_y, sigm_psi_f


# ----------------------------------------------------------------------------
# Deterministic parameter init (shapes from GridAttentionBlockND.__init__)
# ----------------------------------------------------------------------------
def init_params(key, in_channels, gating_channels, inter_channels, sub_sample_factor):
    sh, sw = sub_sample_factor
    C, Cg, F_ = in_channels, gating_channels, inter_channels
    ks = jax.random.split(key, 8)

    def kaiming(k, shape):  # kaiming_normal_, a=0, mode='fan_in'
        fan_in = int(np.prod(shape[1:]))
        return np.sqrt(2.0 / fan_in) * jax.random.normal(k, shape, jnp.float32)

    def conv_bias(k, shape, fan_in):  # PyTorch default conv bias init
        bound = 1.0 / np.sqrt(fan_in)
        return jax.random.uniform(k, shape, jnp.float32, -bound, bound)

    return {
        "theta_w": kaiming(ks[0], (F_, C, sh, sw)),          # bias=False
        "phi_w": kaiming(ks[1], (F_, Cg, 1, 1)),
        "phi_b": conv_bias(ks[2], (F_,), Cg),
        "psi_w": kaiming(ks[3], (1, F_, 1, 1)),
        "psi_b": conv_bias(ks[4], (1,), F_),
        "w_w": kaiming(ks[5], (C, C, 1, 1)),
        "w_b": conv_bias(ks[6], (C,), C),
        "bn_gamma": 1.0 + 0.02 * jax.random.normal(ks[7], (C,), jnp.float32),
        "bn_beta": jnp.zeros((C,), jnp.float32),
    }


# ----------------------------------------------------------------------------
# Pure-JAX reference (same math) for a sanity check
# ----------------------------------------------------------------------------
def reference_forward(x, g, params, sub_sample_factor=(2, 2)):
    N, C, H, W = x.shape
    _, Cg, Hg, Wg = g.shape
    sh, sw = sub_sample_factor
    Ho, Wo = H // sh, W // sw
    F_ = params["theta_w"].shape[0]
    x_r = x.reshape(N, C, Ho, sh, Wo, sw)
    x_patch = x_r.transpose(0, 1, 3, 5, 2, 4).reshape(N, C * sh * sw, Ho * Wo)
    x_flat = x.reshape(N, C, H * W)
    g_flat = g.reshape(N, Cg, Hg * Wg)
    theta_w = params["theta_w"].reshape(F_, C * sh * sw)
    phi_w = params["phi_w"].reshape(F_, Cg)
    phi_b = params["phi_b"].reshape(1, F_, 1)
    psi_w = params["psi_w"].reshape(1, F_)
    psi_b = params["psi_b"].reshape(1, 1, 1)
    Ug = jnp.asarray(np.kron(_interp_matrix_1d(Ho, Hg), _interp_matrix_1d(Wo, Wg)))
    Ux = jnp.asarray(np.kron(_interp_matrix_1d(H, Ho), _interp_matrix_1d(W, Wo)))
    theta_x = jnp.einsum("fk,nks->nfs", theta_w, x_patch)
    phi = jnp.einsum("fc,ncs->nfs", phi_w, g_flat) + phi_b
    phi_up = jnp.einsum("nfs,ts->nft", phi, Ug)
    f = jnp.maximum(theta_x + phi_up, 0.0)
    psi = jnp.einsum("of,nfs->nos", psi_w, f) + psi_b
    sigm = 1.0 / (1.0 + jnp.exp(-psi))
    sigm_up = jnp.einsum("nos,ts->not", sigm, Ux)
    y = sigm_up * x_flat
    w_w = params["w_w"].reshape(C, C)
    w_b = params["w_b"].reshape(1, C, 1)
    wy = jnp.einsum("oc,ncs->nos", w_w, y) + w_b
    mean = wy.mean(axis=(0, 2), keepdims=True)
    var = ((wy - mean) ** 2).mean(axis=(0, 2), keepdims=True)  # biased (training BN)
    gamma = params["bn_gamma"].reshape(1, C, 1)
    beta = params["bn_beta"].reshape(1, C, 1)
    wy_bn = (wy - mean) * jax.lax.rsqrt(var + 1e-5) * gamma + beta
    return wy_bn.reshape(N, C, H, W), sigm_up.reshape(N, 1, H, W)


if __name__ == "__main__":
    key = jax.random.PRNGKey(0)
    kx, kg, kp = jax.random.split(key, 3)

    # small shapes consistent with the module (dimension=2, sub_sample_factor=(2,2))
    N, C, H, W = 2, 4, 16, 16          # x: skip connection
    Cg, Hg, Wg = 8, 4, 4               # g: gating signal (coarser spatial grid)
    F_ = max(C // 2, 1)                # inter_channels default
    ssf = (2, 2)

    x = jax.random.normal(kx, (N, C, H, W), jnp.float32)
    g = jax.random.normal(kg, (N, Cg, Hg, Wg), jnp.float32)
    params = init_params(kp, C, Cg, F_, ssf)

    W_y, sigm_psi_f = grid_attention_forward(x, g, params, ssf)
    jax.block_until_ready((W_y, sigm_psi_f))

    # sanity check against a pure-JAX reference (tolerance: bf16 MXU operands)
    W_y_ref, sigm_ref = reference_forward(x, g, params, ssf)
    assert W_y.shape == (N, C, H, W) and sigm_psi_f.shape == (N, 1, H, W)
    assert np.allclose(np.asarray(sigm_psi_f), np.asarray(sigm_ref),
                       atol=5e-2, rtol=5e-2)
    assert np.allclose(np.asarray(W_y), np.asarray(W_y_ref),
                       atol=5e-2, rtol=5e-2)

    print("KERNEL_OK")
</pallas_src>

<mosaic_0001>
module attributes {stable_mosaic.version = 11 : i64} {
  func.func @_attention_kernel(%arg0: i32, %arg1: memref<1x4x256xf32, #tpu.memory_space<vmem>>, %arg2: memref<1x16x64xbf16, #tpu.memory_space<vmem>>, %arg3: memref<1x32x4xbf16, #tpu.memory_space<vmem>>, %arg4: memref<2x16xbf16, #tpu.memory_space<vmem>>, %arg5: memref<8x32xbf16, #tpu.memory_space<vmem>>, %arg6: memref<8x1xf32, #tpu.memory_space<vmem>>, %arg7: memref<4x8xbf16, #tpu.memory_space<vmem>>, %arg8: memref<16x8xbf16, #tpu.memory_space<vmem>>, %arg9: memref<8x16xbf16, #tpu.memory_space<vmem>>, %arg10: memref<1x1xf32, #tpu.memory_space<vmem>>, %arg11: memref<8x16xbf16, #tpu.memory_space<vmem>>, %arg12: memref<8x256xf32, #tpu.memory_space<vmem>>, %arg13: memref<4x4xbf16, #tpu.memory_space<vmem>>, %arg14: memref<4x1xf32, #tpu.memory_space<vmem>>, %arg15: memref<1x1x256xf32, #tpu.memory_space<vmem>>, %arg16: memref<1x4x256xbf16, #tpu.memory_space<vmem>>, %arg17: memref<1x4x2xf32, #tpu.memory_space<vmem>>) attributes {dimension_semantics = [#tpu.dimension_semantics<parallel>], iteration_bounds = array<i64: 2>, scalar_prefetch = 0 : i64, scratch_operands = 0 : i64, tpu.core_type = #tpu.core_type<tc>, window_params = [{transform_indices = @transform_0, window_bounds = array<i64: 1, 4, 256>}, {transform_indices = @transform_1, window_bounds = array<i64: 1, 16, 64>}, {transform_indices = @transform_2, window_bounds = array<i64: 1, 32, 4>}, {pipeline_mode = #tpu.pipeline_mode<synchronous>, transform_indices = @transform_3, window_bounds = array<i64: 2, 16>}, {pipeline_mode = #tpu.pipeline_mode<synchronous>, transform_indices = @transform_4, window_bounds = array<i64: 8, 32>}, {pipeline_mode = #tpu.pipeline_mode<synchronous>, transform_indices = @transform_5, window_bounds = array<i64: 8, 1>}, {pipeline_mode = #tpu.pipeline_mode<synchronous>, transform_indices = @transform_6, window_bounds = array<i64: 4, 8>}, {pipeline_mode = #tpu.pipeline_mode<synchronous>, transform_indices = @transform_7, window_bounds = array<i64: 16, 8>}, {pipeline_mode = #tpu.pipeline_mode<synchronous>, transform_indices = @transform_8, window_bounds = array<i64: 8, 16>}, {pipeline_mode = #tpu.pipeline_mode<synchronous>, transform_indices = @transform_9, window_bounds = array<i64: 1, 1>}, {pipeline_mode = #tpu.pipeline_mode<synchronous>, transform_indices = @transform_10, window_bounds = array<i64: 8, 16>}, {pipeline_mode = #tpu.pipeline_mode<synchronous>, transform_indices = @transform_11, window_bounds = array<i64: 8, 256>}, {pipeline_mode = #tpu.pipeline_mode<synchronous>, transform_indices = @transform_12, window_bounds = array<i64: 4, 4>}, {pipeline_mode = #tpu.pipeline_mode<synchronous>, transform_indices = @transform_13, window_bounds = array<i64: 4, 1>}, {transform_indices = @transform_14, window_bounds = array<i64: 1, 1, 256>}, {transform_indices = @transform_15, window_bounds = array<i64: 1, 4, 256>}, {transform_indices = @transform_16, window_bounds = array<i64: 1, 4, 2>}]} {
    %c0 = arith.constant 0 : index
    %c0_0 = arith.constant 0 : index
    %0 = vector.load %arg4[%c0, %c0_0] : memref<2x16xbf16, #tpu.memory_space<vmem>>, vector<2x16xbf16>
    %c0_1 = arith.constant 0 : index
    %c0_2 = arith.constant 0 : index
    %c0_3 = arith.constant 0 : index
    %1 = vector.load %arg2[%c0_1, %c0_2, %c0_3] : memref<1x16x64xbf16, #tpu.memory_space<vmem>>, vector<1x16x64xbf16>
    %2 = vector.shape_cast %1 : vector<1x16x64xbf16> to vector<16x64xbf16>
    %cst = arith.constant dense<0.000000e+00> : vector<2x64xf32>
    %3 = tpu.matmul %0, %2, %cst {dimension_numbers = #tpu.dot_dimension_numbers<[1], [0], [0], [1], [0, 0, 1, 1], [], []>} : vector<2x16xbf16>, vector<16x64xbf16>, vector<2x64xf32> -> vector<2x64xf32>
    %c0_4 = arith.constant 0 : index
    %c0_5 = arith.constant 0 : index
    %4 = vector.load %arg5[%c0_4, %c0_5] : memref<8x32xbf16, #tpu.memory_space<vmem>>, vector<8x32xbf16>
    %c0_6 = arith.constant 0 : index
    %c0_7 = arith.constant 0 : index
    %c0_8 = arith.constant 0 : index
    %5 = vector.load %arg3[%c0_6, %c0_7, %c0_8] : memref<1x32x4xbf16, #tpu.memory_space<vmem>>, vector<1x32x4xbf16>
    %6 = vector.shape_cast %5 : vector<1x32x4xbf16> to vector<32x4xbf16>
    %cst_9 = arith.constant dense<0.000000e+00> : vector<8x4xf32>
    %7 = tpu.matmul %4, %6, %cst_9 {dimension_numbers = #tpu.dot_dimension_numbers<[1], [0], [0], [1], [0, 0, 1, 1], [], []>} : vector<8x32xbf16>, vector<32x4xbf16>, vector<8x4xf32> -> vector<8x4xf32>
    %c0_10 = arith.constant 0 : index
    %c0_11 = arith.constant 0 : index
    %8 = vector.load %arg6[%c0_10, %c0_11] : memref<8x1xf32, #tpu.memory_space<vmem>>, vector<8x1xf32>
    %9 = vector.broadcast %8 : vector<8x1xf32> to vector<8x4xf32>
    %10 = arith.addf %7, %9 : vector<8x4xf32>
    %11 = arith.truncf %10 : vector<8x4xf32> to vector<8x4xbf16>
    %c0_12 = arith.constant 0 : index
    %c0_13 = arith.constant 0 : index
    %12 = vector.load %arg7[%c0_12, %c0_13] : memref<4x8xbf16, #tpu.memory_space<vmem>>, vector<4x8xbf16>
    %cst_14 = arith.constant dense<0.000000e+00> : vector<8x8xf32>
    %13 = tpu.matmul %11, %12, %cst_14 {dimension_numbers = #tpu.dot_dimension_numbers<[1], [0], [0], [1], [0, 0, 1, 1], [], []>} : vector<8x4xbf16>, vector<4x8xbf16>, vector<8x8xf32> -> vector<8x8xf32>
    %c0_15 = arith.constant 0 : index
    %c0_16 = arith.constant 0 : index
    %14 = vector.load %arg8[%c0_15, %c0_16] : memref<16x8xbf16, #tpu.memory_space<vmem>>, vector<16x8xbf16>
    %15 = arith.truncf %13 : vector<8x8xf32> to vector<8x8xbf16>
    %cst_17 = arith.constant dense<0.000000e+00> : vector<16x8xf32>
    %16 = tpu.matmul %14, %15, %cst_17 {dimension_numbers = #tpu.dot_dimension_numbers<[1], [0], [0], [1], [0, 0, 1, 1], [], []>} : vector<16x8xbf16>, vector<8x8xbf16>, vector<16x8xf32> -> vector<16x8xf32>
    %17 = vector.extract_strided_slice %3 {offsets = [0, 0], sizes = [2, 8], strides = [1, 1]} : vector<2x64xf32> to vector<2x8xf32>
    %18 = vector.extract_strided_slice %3 {offsets = [0, 8], sizes = [2, 8], strides = [1, 1]} : vector<2x64xf32> to vector<2x8xf32>
    %19 = vector.extract_strided_slice %3 {offsets = [0, 16], sizes = [2, 8], strides = [1, 1]} : vector<2x64xf32> to vector<2x8xf32>
    %20 = vector.extract_strided_slice %3 {offsets = [0, 24], sizes = [2, 8], strides = [1, 1]} : vector<2x64xf32> to vector<2x8xf32>
    %21 = vector.extract_strided_slice %3 {offsets = [0, 32], sizes = [2, 8], strides = [1, 1]} : vector<2x64xf32> to vector<2x8xf32>
    %22 = vector.extract_strided_slice %3 {offsets = [0, 40], sizes = [2, 8], strides = [1, 1]} : vector<2x64xf32> to vector<2x8xf32>
    %23 = vector.extract_strided_slice %3 {offsets = [0, 48], sizes = [2, 8], strides = [1, 1]} : vector<2x64xf32> to vector<2x8xf32>
    %24 = vector.extract_strided_slice %3 {offsets = [0, 56], sizes = [2, 8], strides = [1, 1]} : vector<2x64xf32> to vector<2x8xf32>
    %25 = tpu.concatenate %17, %18, %19, %20, %21, %22, %23, %24 in 0 : vector<2x8xf32>, vector<2x8xf32>, vector<2x8xf32>, vector<2x8xf32>, vector<2x8xf32>, vector<2x8xf32>, vector<2x8xf32>, vector<2x8xf32> -> vector<16x8xf32>
    %26 = arith.addf %25, %16 : vector<16x8xf32>
    %cst_18 = arith.constant 0.000000e+00 : f32
    %27 = vector.broadcast %cst_18 : f32 to vector<16x8xf32>
    %28 = arith.maximumf %26, %27 : vector<16x8xf32>
    %c0_19 = arith.constant 0 : index
    %c0_20 = arith.constant 0 : index
    %29 = vector.load %arg9[%c0_19, %c0_20] : memref<8x16xbf16, #tpu.memory_space<vmem>>, vector<8x16xbf16>
    %30 = arith.truncf %28 : vector<16x8xf32> to vector<16x8xbf16>
    %cst_21 = arith.constant dense<0.000000e+00> : vector<8x8xf32>
    %31 = tpu.matmul %29, %30, %cst_21 {dimension_numbers = #tpu.dot_dimension_numbers<[1], [0], [0], [1], [0, 0, 1, 1], [], []>} : vector<8x16xbf16>, vector<16x8xbf16>, vector<8x8xf32> -> vector<8x8xf32>
    %c0_22 = arith.constant 0 : index
    %c0_23 = arith.constant 0 : index
    %32 = vector.load %arg10[%c0_22, %c0_23] : memref<1x1xf32, #tpu.memory_space<vmem>>, vector<1x1xf32>
    %33 = vector.broadcast %32 : vector<1x1xf32> to vector<8x8xf32>
    %34 = arith.addf %31, %33 : vector<8x8xf32>
    %cst_24 = arith.constant 0.000000e+00 : f32
    %35 = vector.broadcast %cst_24 : f32 to vector<8x8xf32>
    %36 = arith.subf %35, %34 : vector<8x8xf32>
    %37 = math.exp %36 : vector<8x8xf32>
    %cst_25 = arith.constant 1.000000e+00 : f32
    %38 = vector.broadcast %cst_25 : f32 to vector<8x8xf32>
    %39 = arith.addf %38, %37 : vector<8x8xf32>
    %40 = tpu.reciprocal %39 : vector<8x8xf32> -> vector<8x8xf32>
    %41 = arith.truncf %40 : vector<8x8xf32> to vector<8x8xbf16>
    %c0_26 = arith.constant 0 : index
    %c0_27 = arith.constant 0 : index
    %42 = vector.load %arg11[%c0_26, %c0_27] : memref<8x16xbf16, #tpu.memory_space<vmem>>, vector<8x16xbf16>
    %cst_28 = arith.constant dense<0.000000e+00> : vector<8x16xf32>
    %43 = tpu.matmul %41, %42, %cst_28 {dimension_numbers = #tpu.dot_dimension_numbers<[1], [0], [0], [1], [0, 0, 1, 1], [], []>} : vector<8x8xbf16>, vector<8x16xbf16>, vector<8x16xf32> -> vector<8x16xf32>
    %44 = tpu.concatenate %43, %43, %43, %43, %43, %43, %43, %43, %43, %43, %43, %43, %43, %43, %43, %43 in 1 : vector<8x16xf32>, vector<8x16xf32>, vector<8x16xf32>, vector<8x16xf32>, vector<8x16xf32>, vector<8x16xf32>, vector<8x16xf32>, vector<8x16xf32>, vector<8x16xf32>, vector<8x16xf32>, vector<8x16xf32>, vector<8x16xf32>, vector<8x16xf32>, vector<8x16xf32>, vector<8x16xf32>, vector<8x16xf32> -> vector<8x256xf32>
    %c0_29 = arith.constant 0 : index
    %c0_30 = arith.constant 0 : index
    %45 = vector.load %arg12[%c0_29, %c0_30] : memref<8x256xf32, #tpu.memory_space<vmem>>, vector<8x256xf32>
    %46 = arith.mulf %45, %44 : vector<8x256xf32>
    %cst_31 = arith.constant dense<0.000000e+00> : vector<256xf32>
    %47 = vector.multi_reduction <add>, %46, %cst_31 [0] : vector<8x256xf32> to vector<256xf32>
    %48 = vector.shape_cast %47 : vector<256xf32> to vector<1x256xf32>
    %c0_32 = arith.constant 0 : index
    %c0_33 = arith.constant 0 : index
    %c0_34 = arith.constant 0 : index
    %49 = vector.load %arg15[%c0_32, %c0_33, %c0_34] : memref<1x1x256xf32, #tpu.memory_space<vmem>>, vector<1x1x256xf32>
    %50 = vector.shape_cast %49 : vector<1x1x256xf32> to vector<1x256xf32>
    %51 = vector.shape_cast %48 : vector<1x256xf32> to vector<1x1x256xf32>
    tpu.vector_store %arg15[%c0_32, %c0_33, %c0_34], %51 {strides = array<i32>} : memref<1x1x256xf32, #tpu.memory_space<vmem>>, vector<1x1x256xf32>,
    %c0_35 = arith.constant 0 : index
    %c0_36 = arith.constant 0 : index
    %c0_37 = arith.constant 0 : index
    %52 = vector.load %arg1[%c0_35, %c0_36, %c0_37] : memref<1x4x256xf32, #tpu.memory_space<vmem>>, vector<1x4x256xf32>
    %53 = vector.shape_cast %52 : vector<1x4x256xf32> to vector<4x256xf32>
    %54 = vector.broadcast %48 : vector<1x256xf32> to vector<4x256xf32>
    %55 = arith.mulf %53, %54 : vector<4x256xf32>
    %c0_38 = arith.constant 0 : index
    %c0_39 = arith.constant 0 : index
    %56 = vector.load %arg13[%c0_38, %c0_39] : memref<4x4xbf16, #tpu.memory_space<vmem>>, vector<4x4xbf16>
    %57 = arith.truncf %55 : vector<4x256xf32> to vector<4x256xbf16>
    %cst_40 = arith.constant dense<0.000000e+00> : vector<4x256xf32>
    %58 = tpu.matmul %56, %57, %cst_40 {dimension_numbers = #tpu.dot_dimension_numbers<[1], [0], [0], [1], [0, 0, 1, 1], [], []>} : vector<4x4xbf16>, vector<4x256xbf16>, vector<4x256xf32> -> vector<4x256xf32>
    %c0_41 = arith.constant 0 : index
    %c0_42 = arith.constant 0 : index
    %59 = vector.load %arg14[%c0_41, %c0_42] : memref<4x1xf32, #tpu.memory_space<vmem>>, vector<4x1xf32>
    %60 = vector.broadcast %59 : vector<4x1xf32> to vector<4x256xf32>
    %61 = arith.addf %58, %60 : vector<4x256xf32>
    %62 = arith.truncf %61 : vector<4x256xf32> to vector<4x256xbf16>
    %c0_43 = arith.constant 0 : index
    %c0_44 = arith.constant 0 : index
    %c0_45 = arith.constant 0 : index
    %63 = vector.load %arg16[%c0_43, %c0_44, %c0_45] : memref<1x4x256xbf16, #tpu.memory_space<vmem>>, vector<1x4x256xbf16>
    %64 = vector.shape_cast %63 : vector<1x4x256xbf16> to vector<4x256xbf16>
    %65 = vector.shape_cast %62 : vector<4x256xbf16> to vector<1x4x256xbf16>
    tpu.vector_store %arg16[%c0_43, %c0_44, %c0_45], %65 {strides = array<i32>} : memref<1x4x256xbf16, #tpu.memory_space<vmem>>, vector<1x4x256xbf16>,
    %cst_46 = arith.constant dense<0.000000e+00> : vector<4xf32>
    %66 = vector.multi_reduction <add>, %61, %cst_46 [1] : vector<4x256xf32> to vector<4xf32>
    %67 = vector.shape_cast %66 : vector<4xf32> to vector<4x1xf32>
    %cst_47 = arith.constant 3.906250e-03 : f32
    %68 = vector.broadcast %cst_47 : f32 to vector<4x1xf32>
    %69 = arith.mulf %67, %68 : vector<4x1xf32>
    %70 = vector.broadcast %69 : vector<4x1xf32> to vector<4x256xf32>
    %71 = arith.subf %61, %70 : vector<4x256xf32>
    %72 = arith.mulf %71, %71 : vector<4x256xf32>
    %cst_48 = arith.constant dense<0.000000e+00> : vector<4xf32>
    %73 = vector.multi_reduction <add>, %72, %cst_48 [1] : vector<4x256xf32> to vector<4xf32>
    %74 = vector.shape_cast %73 : vector<4xf32> to vector<4x1xf32>
    %75 = tpu.concatenate %69, %74 in 1 : vector<4x1xf32>, vector<4x1xf32> -> vector<4x2xf32>
    %c0_49 = arith.constant 0 : index
    %c0_50 = arith.constant 0 : index
    %c0_51 = arith.constant 0 : index
    %76 = vector.load %arg17[%c0_49, %c0_50, %c0_51] : memref<1x4x2xf32, #tpu.memory_space<vmem>>, vector<1x4x2xf32>
    %77 = vector.shape_cast %76 : vector<1x4x2xf32> to vector<4x2xf32>
    %78 = vector.shape_cast %75 : vector<4x2xf32> to vector<1x4x2xf32>
    tpu.vector_store %arg17[%c0_49, %c0_50, %c0_51], %78 {strides = array<i32>} : memref<1x4x2xf32, #tpu.memory_space<vmem>>, vector<1x4x2xf32>,
    return
  }
  func.func @transform_0(%arg0: i32) -> (i32, i32, i32) {
    %c0_i32 = arith.constant 0 : i32
    %c0_i32_0 = arith.constant 0 : i32
    %c0_i32_1 = arith.constant 0 : i32
    return %arg0, %c0_i32, %c0_i32_0 : i32, i32, i32
  }
  func.func @transform_1(%arg0: i32) -> (i32, i32, i32) {
    %c0_i32 = arith.constant 0 : i32
    %c0_i32_0 = arith.constant 0 : i32
    %c0_i32_1 = arith.constant 0 : i32
    return %arg0, %c0_i32, %c0_i32_0 : i32, i32, i32
  }
  func.func @transform_2(%arg0: i32) -> (i32, i32, i32) {
    %c0_i32 = arith.constant 0 : i32
    %c0_i32_0 = arith.constant 0 : i32
    %c0_i32_1 = arith.constant 0 : i32
    return %arg0, %c0_i32, %c0_i32_0 : i32, i32, i32
  }
  func.func @transform_3(%arg0: i32) -> (i32, i32) {
    %c0_i32 = arith.constant 0 : i32
    %c0_i32_0 = arith.constant 0 : i32
    %c0_i32_1 = arith.constant 0 : i32
    return %c0_i32, %c0_i32_0 : i32, i32
  }
  func.func @transform_4(%arg0: i32) -> (i32, i32) {
    %c0_i32 = arith.constant 0 : i32
    %c0_i32_0 = arith.constant 0 : i32
    %c0_i32_1 = arith.constant 0 : i32
    return %c0_i32, %c0_i32_0 : i32, i32
  }
  func.func @transform_5(%arg0: i32) -> (i32, i32) {
    %c0_i32 = arith.constant 0 : i32
    %c0_i32_0 = arith.constant 0 : i32
    %c0_i32_1 = arith.constant 0 : i32
    return %c0_i32, %c0_i32_0 : i32, i32
  }
  func.func @transform_6(%arg0: i32) -> (i32, i32) {
    %c0_i32 = arith.constant 0 : i32
    %c0_i32_0 = arith.constant 0 : i32
    %c0_i32_1 = arith.constant 0 : i32
    return %c0_i32, %c0_i32_0 : i32, i32
  }
  func.func @transform_7(%arg0: i32) -> (i32, i32) {
    %c0_i32 = arith.constant 0 : i32
    %c0_i32_0 = arith.constant 0 : i32
    %c0_i32_1 = arith.constant 0 : i32
    return %c0_i32, %c0_i32_0 : i32, i32
  }
  func.func @transform_8(%arg0: i32) -> (i32, i32) {
    %c0_i32 = arith.constant 0 : i32
    %c0_i32_0 = arith.constant 0 : i32
    %c0_i32_1 = arith.constant 0 : i32
    return %c0_i32, %c0_i32_0 : i32, i32
  }
  func.func @transform_9(%arg0: i32) -> (i32, i32) {
    %c0_i32 = arith.constant 0 : i32
    %c0_i32_0 = arith.constant 0 : i32
    %c0_i32_1 = arith.constant 0 : i32
    return %c0_i32, %c0_i32_0 : i32, i32
  }
  func.func @transform_10(%arg0: i32) -> (i32, i32) {
    %c0_i32 = arith.constant 0 : i32
    %c0_i32_0 = arith.constant 0 : i32
    %c0_i32_1 = arith.constant 0 : i32
    return %c0_i32, %c0_i32_0 : i32, i32
  }
  func.func @transform_11(%arg0: i32) -> (i32, i32) {
    %c0_i32 = arith.constant 0 : i32
    %c0_i32_0 = arith.constant 0 : i32
    %c0_i32_1 = arith.constant 0 : i32
    return %c0_i32, %c0_i32_0 : i32, i32
  }
  func.func @transform_12(%arg0: i32) -> (i32, i32) {
    %c0_i32 = arith.constant 0 : i32
    %c0_i32_0 = arith.constant 0 : i32
    %c0_i32_1 = arith.constant 0 : i32
    return %c0_i32, %c0_i32_0 : i32, i32
  }
  func.func @transform_13(%arg0: i32) -> (i32, i32) {
    %c0_i32 = arith.constant 0 : i32
    %c0_i32_0 = arith.constant 0 : i32
    %c0_i32_1 = arith.constant 0 : i32
    return %c0_i32, %c0_i32_0 : i32, i32
  }
  func.func @transform_14(%arg0: i32) -> (i32, i32, i32) {
    %c0_i32 = arith.constant 0 : i32
    %c0_i32_0 = arith.constant 0 : i32
    %c0_i32_1 = arith.constant 0 : i32
    return %arg0, %c0_i32, %c0_i32_0 : i32, i32, i32
  }
  func.func @transform_15(%arg0: i32) -> (i32, i32, i32) {
    %c0_i32 = arith.constant 0 : i32
    %c0_i32_0 = arith.constant 0 : i32
    %c0_i32_1 = arith.constant 0 : i32
    return %arg0, %c0_i32, %c0_i32_0 : i32, i32, i32
  }
  func.func @transform_16(%arg0: i32) -> (i32, i32, i32) {
    %c0_i32 = arith.constant 0 : i32
    %c0_i32_0 = arith.constant 0 : i32
    %c0_i32_1 = arith.constant 0 : i32
    return %arg0, %c0_i32, %c0_i32_0 : i32, i32, i32
  }
}

module attributes {stable_mosaic.version = 11 : i64} {
  func.func @_attention_kernel(%arg0: i32, %arg1: memref<1x4x256xf32, #tpu.memory_space<vmem>>, %arg2: memref<1x16x64xbf16, #tpu.memory_space<vmem>>, %arg3: memref<1x32x4xbf16, #tpu.memory_space<vmem>>, %arg4: memref<2x16xbf16, #tpu.memory_space<vmem>>, %arg5: memref<8x32xbf16, #tpu.memory_space<vmem>>, %arg6: memref<8x1xf32, #tpu.memory_space<vmem>>, %arg7: memref<4x8xbf16, #tpu.memory_space<vmem>>, %arg8: memref<16x8xbf16, #tpu.memory_space<vmem>>, %arg9: memref<8x16xbf16, #tpu.memory_space<vmem>>, %arg10: memref<1x1xf32, #tpu.memory_space<vmem>>, %arg11: memref<8x16xbf16, #tpu.memory_space<vmem>>, %arg12: memref<8x256xf32, #tpu.memory_space<vmem>>, %arg13: memref<4x4xbf16, #tpu.memory_space<vmem>>, %arg14: memref<4x1xf32, #tpu.memory_space<vmem>>, %arg15: memref<1x1x256xf32, #tpu.memory_space<vmem>>, %arg16: memref<1x4x256xbf16, #tpu.memory_space<vmem>>, %arg17: memref<1x4x2xf32, #tpu.memory_space<vmem>>) attributes {dimension_semantics = [#tpu.dimension_semantics<parallel>], iteration_bounds = array<i64: 2>, scalar_prefetch = 0 : i64, scratch_operands = 0 : i64, tpu.core_type = #tpu.core_type<tc>, window_params = [{transform_indices = @transform_0, window_bounds = array<i64: 1, 4, 256>}, {transform_indices = @transform_1, window_bounds = array<i64: 1, 16, 64>}, {transform_indices = @transform_2, window_bounds = array<i64: 1, 32, 4>}, {pipeline_mode = #tpu.pipeline_mode<synchronous>, transform_indices = @transform_3, window_bounds = array<i64: 2, 16>}, {pipeline_mode = #tpu.pipeline_mode<synchronous>, transform_indices = @transform_4, window_bounds = array<i64: 8, 32>}, {pipeline_mode = #tpu.pipeline_mode<synchronous>, transform_indices = @transform_5, window_bounds = array<i64: 8, 1>}, {pipeline_mode = #tpu.pipeline_mode<synchronous>, transform_indices = @transform_6, window_bounds = array<i64: 4, 8>}, {pipeline_mode = #tpu.pipeline_mode<synchronous>, transform_indices = @transform_7, window_bounds = array<i64: 16, 8>}, {pipeline_mode = #tpu.pipeline_mode<synchronous>, transform_indices = @transform_8, window_bounds = array<i64: 8, 16>}, {pipeline_mode = #tpu.pipeline_mode<synchronous>, transform_indices = @transform_9, window_bounds = array<i64: 1, 1>}, {pipeline_mode = #tpu.pipeline_mode<synchronous>, transform_indices = @transform_10, window_bounds = array<i64: 8, 16>}, {pipeline_mode = #tpu.pipeline_mode<synchronous>, transform_indices = @transform_11, window_bounds = array<i64: 8, 256>}, {pipeline_mode = #tpu.pipeline_mode<synchronous>, transform_indices = @transform_12, window_bounds = array<i64: 4, 4>}, {pipeline_mode = #tpu.pipeline_mode<synchronous>, transform_indices = @transform_13, window_bounds = array<i64: 4, 1>}, {transform_indices = @transform_14, window_bounds = array<i64: 1, 1, 256>}, {transform_indices = @transform_15, window_bounds = array<i64: 1, 4, 256>}, {transform_indices = @transform_16, window_bounds = array<i64: 1, 4, 2>}]} {
    %c0 = arith.constant 0 : index
    %c0_0 = arith.constant 0 : index
    %0 = vector.load %arg4[%c0, %c0_0] : memref<2x16xbf16, #tpu.memory_space<vmem>>, vector<2x16xbf16>
    %c0_1 = arith.constant 0 : index
    %c0_2 = arith.constant 0 : index
    %c0_3 = arith.constant 0 : index
    %1 = vector.load %arg2[%c0_1, %c0_2, %c0_3] : memref<1x16x64xbf16, #tpu.memory_space<vmem>>, vector<1x16x64xbf16>
    %2 = vector.shape_cast %1 : vector<1x16x64xbf16> to vector<16x64xbf16>
    %cst = arith.constant dense<0.000000e+00> : vector<2x64xf32>
    %3 = tpu.matmul %0, %2, %cst {dimension_numbers = #tpu.dot_dimension_numbers<[1], [0], [0], [1], [0, 0, 1, 1], [], []>} : vector<2x16xbf16>, vector<16x64xbf16>, vector<2x64xf32> -> vector<2x64xf32>
    %c0_4 = arith.constant 0 : index
    %c0_5 = arith.constant 0 : index
    %4 = vector.load %arg5[%c0_4, %c0_5] : memref<8x32xbf16, #tpu.memory_space<vmem>>, vector<8x32xbf16>
    %c0_6 = arith.constant 0 : index
    %c0_7 = arith.constant 0 : index
    %c0_8 = arith.constant 0 : index
    %5 = vector.load %arg3[%c0_6, %c0_7, %c0_8] : memref<1x32x4xbf16, #tpu.memory_space<vmem>>, vector<1x32x4xbf16>
    %6 = vector.shape_cast %5 : vector<1x32x4xbf16> to vector<32x4xbf16>
    %cst_9 = arith.constant dense<0.000000e+00> : vector<8x4xf32>
    %7 = tpu.matmul %4, %6, %cst_9 {dimension_numbers = #tpu.dot_dimension_numbers<[1], [0], [0], [1], [0, 0, 1, 1], [], []>} : vector<8x32xbf16>, vector<32x4xbf16>, vector<8x4xf32> -> vector<8x4xf32>
    %c0_10 = arith.constant 0 : index
    %c0_11 = arith.constant 0 : index
    %8 = vector.load %arg6[%c0_10, %c0_11] : memref<8x1xf32, #tpu.memory_space<vmem>>, vector<8x1xf32>
    %9 = vector.broadcast %8 : vector<8x1xf32> to vector<8x4xf32>
    %10 = arith.addf %7, %9 : vector<8x4xf32>
    %11 = arith.truncf %10 : vector<8x4xf32> to vector<8x4xbf16>
    %c0_12 = arith.constant 0 : index
    %c0_13 = arith.constant 0 : index
    %12 = vector.load %arg7[%c0_12, %c0_13] : memref<4x8xbf16, #tpu.memory_space<vmem>>, vector<4x8xbf16>
    %cst_14 = arith.constant dense<0.000000e+00> : vector<8x8xf32>
    %13 = tpu.matmul %11, %12, %cst_14 {dimension_numbers = #tpu.dot_dimension_numbers<[1], [0], [0], [1], [0, 0, 1, 1], [], []>} : vector<8x4xbf16>, vector<4x8xbf16>, vector<8x8xf32> -> vector<8x8xf32>
    %c0_15 = arith.constant 0 : index
    %c0_16 = arith.constant 0 : index
    %14 = vector.load %arg8[%c0_15, %c0_16] : memref<16x8xbf16, #tpu.memory_space<vmem>>, vector<16x8xbf16>
    %15 = arith.truncf %13 : vector<8x8xf32> to vector<8x8xbf16>
    %cst_17 = arith.constant dense<0.000000e+00> : vector<16x8xf32>
    %16 = tpu.matmul %14, %15, %cst_17 {dimension_numbers = #tpu.dot_dimension_numbers<[1], [0], [0], [1], [0, 0, 1, 1], [], []>} : vector<16x8xbf16>, vector<8x8xbf16>, vector<16x8xf32> -> vector<16x8xf32>
    %17 = vector.extract_strided_slice %3 {offsets = [0, 0], sizes = [2, 8], strides = [1, 1]} : vector<2x64xf32> to vector<2x8xf32>
    %18 = vector.extract_strided_slice %3 {offsets = [0, 8], sizes = [2, 8], strides = [1, 1]} : vector<2x64xf32> to vector<2x8xf32>
    %19 = vector.extract_strided_slice %3 {offsets = [0, 16], sizes = [2, 8], strides = [1, 1]} : vector<2x64xf32> to vector<2x8xf32>
    %20 = vector.extract_strided_slice %3 {offsets = [0, 24], sizes = [2, 8], strides = [1, 1]} : vector<2x64xf32> to vector<2x8xf32>
    %21 = vector.extract_strided_slice %3 {offsets = [0, 32], sizes = [2, 8], strides = [1, 1]} : vector<2x64xf32> to vector<2x8xf32>
    %22 = vector.extract_strided_slice %3 {offsets = [0, 40], sizes = [2, 8], strides = [1, 1]} : vector<2x64xf32> to vector<2x8xf32>
    %23 = vector.extract_strided_slice %3 {offsets = [0, 48], sizes = [2, 8], strides = [1, 1]} : vector<2x64xf32> to vector<2x8xf32>
    %24 = vector.extract_strided_slice %3 {offsets = [0, 56], sizes = [2, 8], strides = [1, 1]} : vector<2x64xf32> to vector<2x8xf32>
    %25 = tpu.concatenate %17, %18, %19, %20, %21, %22, %23, %24 in 0 : vector<2x8xf32>, vector<2x8xf32>, vector<2x8xf32>, vector<2x8xf32>, vector<2x8xf32>, vector<2x8xf32>, vector<2x8xf32>, vector<2x8xf32> -> vector<16x8xf32>
    %26 = arith.addf %25, %16 : vector<16x8xf32>
    %cst_18 = arith.constant 0.000000e+00 : f32
    %27 = vector.broadcast %cst_18 : f32 to vector<16x8xf32>
    %28 = arith.maximumf %26, %27 : vector<16x8xf32>
    %c0_19 = arith.constant 0 : index
    %c0_20 = arith.constant 0 : index
    %29 = vector.load %arg9[%c0_19, %c0_20] : memref<8x16xbf16, #tpu.memory_space<vmem>>, vector<8x16xbf16>
    %30 = arith.truncf %28 : vector<16x8xf32> to vector<16x8xbf16>
    %cst_21 = arith.constant dense<0.000000e+00> : vector<8x8xf32>
    %31 = tpu.matmul %29, %30, %cst_21 {dimension_numbers = #tpu.dot_dimension_numbers<[1], [0], [0], [1], [0, 0, 1, 1], [], []>} : vector<8x16xbf16>, vector<16x8xbf16>, vector<8x8xf32> -> vector<8x8xf32>
    %c0_22 = arith.constant 0 : index
    %c0_23 = arith.constant 0 : index
    %32 = vector.load %arg10[%c0_22, %c0_23] : memref<1x1xf32, #tpu.memory_space<vmem>>, vector<1x1xf32>
    %33 = vector.broadcast %32 : vector<1x1xf32> to vector<8x8xf32>
    %34 = arith.addf %31, %33 : vector<8x8xf32>
    %cst_24 = arith.constant 0.000000e+00 : f32
    %35 = vector.broadcast %cst_24 : f32 to vector<8x8xf32>
    %36 = arith.subf %35, %34 : vector<8x8xf32>
    %37 = math.exp %36 : vector<8x8xf32>
    %cst_25 = arith.constant 1.000000e+00 : f32
    %38 = vector.broadcast %cst_25 : f32 to vector<8x8xf32>
    %39 = arith.addf %38, %37 : vector<8x8xf32>
    %40 = tpu.reciprocal %39 : vector<8x8xf32> -> vector<8x8xf32>
    %41 = arith.truncf %40 : vector<8x8xf32> to vector<8x8xbf16>
    %c0_26 = arith.constant 0 : index
    %c0_27 = arith.constant 0 : index
    %42 = vector.load %arg11[%c0_26, %c0_27] : memref<8x16xbf16, #tpu.memory_space<vmem>>, vector<8x16xbf16>
    %cst_28 = arith.constant dense<0.000000e+00> : vector<8x16xf32>
    %43 = tpu.matmul %41, %42, %cst_28 {dimension_numbers = #tpu.dot_dimension_numbers<[1], [0], [0], [1], [0, 0, 1, 1], [], []>} : vector<8x8xbf16>, vector<8x16xbf16>, vector<8x16xf32> -> vector<8x16xf32>
    %44 = tpu.concatenate %43, %43, %43, %43, %43, %43, %43, %43, %43, %43, %43, %43, %43, %43, %43, %43 in 1 : vector<8x16xf32>, vector<8x16xf32>, vector<8x16xf32>, vector<8x16xf32>, vector<8x16xf32>, vector<8x16xf32>, vector<8x16xf32>, vector<8x16xf32>, vector<8x16xf32>, vector<8x16xf32>, vector<8x16xf32>, vector<8x16xf32>, vector<8x16xf32>, vector<8x16xf32>, vector<8x16xf32>, vector<8x16xf32> -> vector<8x256xf32>
    %c0_29 = arith.constant 0 : index
    %c0_30 = arith.constant 0 : index
    %45 = vector.load %arg12[%c0_29, %c0_30] : memref<8x256xf32, #tpu.memory_space<vmem>>, vector<8x256xf32>
    %46 = arith.mulf %45, %44 : vector<8x256xf32>
    %cst_31 = arith.constant dense<0.000000e+00> : vector<256xf32>
    %47 = vector.multi_reduction <add>, %46, %cst_31 [0] : vector<8x256xf32> to vector<256xf32>
    %48 = vector.shape_cast %47 : vector<256xf32> to vector<1x256xf32>
    %c0_32 = arith.constant 0 : index
    %c0_33 = arith.constant 0 : index
    %c0_34 = arith.constant 0 : index
    %49 = vector.load %arg15[%c0_32, %c0_33, %c0_34] : memref<1x1x256xf32, #tpu.memory_space<vmem>>, vector<1x1x256xf32>
    %50 = vector.shape_cast %49 : vector<1x1x256xf32> to vector<1x256xf32>
    %51 = vector.shape_cast %48 : vector<1x256xf32> to vector<1x1x256xf32>
    tpu.vector_store %arg15[%c0_32, %c0_33, %c0_34], %51 {strides = array<i32>} : memref<1x1x256xf32, #tpu.memory_space<vmem>>, vector<1x1x256xf32>,
    %c0_35 = arith.constant 0 : index
    %c0_36 = arith.constant 0 : index
    %c0_37 = arith.constant 0 : index
    %52 = vector.load %arg1[%c0_35, %c0_36, %c0_37] : memref<1x4x256xf32, #tpu.memory_space<vmem>>, vector<1x4x256xf32>
    %53 = vector.shape_cast %52 : vector<1x4x256xf32> to vector<4x256xf32>
    %54 = vector.broadcast %48 : vector<1x256xf32> to vector<4x256xf32>
    %55 = arith.mulf %53, %54 : vector<4x256xf32>
    %c0_38 = arith.constant 0 : index
    %c0_39 = arith.constant 0 : index
    %56 = vector.load %arg13[%c0_38, %c0_39] : memref<4x4xbf16, #tpu.memory_space<vmem>>, vector<4x4xbf16>
    %57 = arith.truncf %55 : vector<4x256xf32> to vector<4x256xbf16>
    %cst_40 = arith.constant dense<0.000000e+00> : vector<4x256xf32>
    %58 = tpu.matmul %56, %57, %cst_40 {dimension_numbers = #tpu.dot_dimension_numbers<[1], [0], [0], [1], [0, 0, 1, 1], [], []>} : vector<4x4xbf16>, vector<4x256xbf16>, vector<4x256xf32> -> vector<4x256xf32>
    %c0_41 = arith.constant 0 : index
    %c0_42 = arith.constant 0 : index
    %59 = vector.load %arg14[%c0_41, %c0_42] : memref<4x1xf32, #tpu.memory_space<vmem>>, vector<4x1xf32>
    %60 = vector.broadcast %59 : vector<4x1xf32> to vector<4x256xf32>
    %61 = arith.addf %58, %60 : vector<4x256xf32>
    %62 = arith.truncf %61 : vector<4x256xf32> to vector<4x256xbf16>
    %c0_43 = arith.constant 0 : index
    %c0_44 = arith.constant 0 : index
    %c0_45 = arith.constant 0 : index
    %63 = vector.load %arg16[%c0_43, %c0_44, %c0_45] : memref<1x4x256xbf16, #tpu.memory_space<vmem>>, vector<1x4x256xbf16>
    %64 = vector.shape_cast %63 : vector<1x4x256xbf16> to vector<4x256xbf16>
    %65 = vector.shape_cast %62 : vector<4x256xbf16> to vector<1x4x256xbf16>
    tpu.vector_store %arg16[%c0_43, %c0_44, %c0_45], %65 {strides = array<i32>} : memref<1x4x256xbf16, #tpu.memory_space<vmem>>, vector<1x4x256xbf16>,
    %cst_46 = arith.constant dense<0.000000e+00> : vector<4xf32>
    %66 = vector.multi_reduction <add>, %61, %cst_46 [1] : vector<4x256xf32> to vector<4xf32>
    %67 = vector.shape_cast %66 : vector<4xf32> to vector<4x1xf32>
    %cst_47 = arith.constant 3.906250e-03 : f32
    %68 = vector.broadcast %cst_47 : f32 to vector<4x1xf32>
    %69 = arith.mulf %67, %68 : vector<4x1xf32>
    %70 = vector.broadcast %69 : vector<4x1xf32> to vector<4x256xf32>
    %71 = arith.subf %61, %70 : vector<4x256xf32>
    %72 = arith.mulf %71, %71 : vector<4x256xf32>
    %cst_48 = arith.constant dense<0.000000e+00> : vector<4xf32>
    %73 = vector.multi_reduction <add>, %72, %cst_48 [1] : vector<4x256xf32> to vector<4xf32>
    %74 = vector.shape_cast %73 : vector<4xf32> to vector<4x1xf32>
    %75 = tpu.concatenate %69, %74 in 1 : vector<4x1xf32>, vector<4x1xf32> -> vector<4x2xf32>
    %c0_49 = arith.constant 0 : index
    %c0_50 = arith.constant 0 : index
    %c0_51 = arith.constant 0 : index
    %76 = vector.load %arg17[%c0_49, %c0_50, %c0_51] : memref<1x4x2xf32, #tpu.memory_space<vmem>>, vector<1x4x2xf32>
    %77 = vector.shape_cast %76 : vector<1x4x2xf32> to vector<4x2xf32>
    %78 = vector.shape_cast %75 : vector<4x2xf32> to vector<1x4x2xf32>
    tpu.vector_store %arg17[%c0_49, %c0_50, %c0_51], %78 {strides = array<i32>} : memref<1x4x2xf32, #tpu.memory_space<vmem>>, vector<1x4x2xf32>,
    return
  }
  func.func @transform_0(%arg0: i32) -> (i32, i32, i32) {
    %c0_i32 = arith.constant 0 : i32
    %c0_i32_0 = arith.constant 0 : i32
    %c0_i32_1 = arith.constant 0 : i32
    return %arg0, %c0_i32, %c0_i32_0 : i32, i32, i32
  }
  func.func @transform_1(%arg0: i32) -> (i32, i32, i32) {
    %c0_i32 = arith.constant 0 : i32
    %c0_i32_0 = arith.constant 0 : i32
    %c0_i32_1 = arith.constant 0 : i32
    return %arg0, %c0_i32, %c0_i32_0 : i32, i32, i32
  }
  func.func @transform_2(%arg0: i32) -> (i32, i32, i32) {
    %c0_i32 = arith.constant 0 : i32
    %c0_i32_0 = arith.constant 0 : i32
    %c0_i32_1 = arith.constant 0 : i32
    return %arg0, %c0_i32, %c0_i32_0 : i32, i32, i32
  }
  func.func @transform_3(%arg0: i32) -> (i32, i32) {
    %c0_i32 = arith.constant 0 : i32
    %c0_i32_0 = arith.constant 0 : i32
    %c0_i32_1 = arith.constant 0 : i32
    return %c0_i32, %c0_i32_0 : i32, i32
  }
  func.func @transform_4(%arg0: i32) -> (i32, i32) {
    %c0_i32 = arith.constant 0 : i32
    %c0_i32_0 = arith.constant 0 : i32
    %c0_i32_1 = arith.constant 0 : i32
    return %c0_i32, %c0_i32_0 : i32, i32
  }
  func.func @transform_5(%arg0: i32) -> (i32, i32) {
    %c0_i32 = arith.constant 0 : i32
    %c0_i32_0 = arith.constant 0 : i32
    %c0_i32_1 = arith.constant 0 : i32
    return %c0_i32, %c0_i32_0 : i32, i32
  }
  func.func @transform_6(%arg0: i32) -> (i32, i32) {
    %c0_i32 = arith.constant 0 : i32
    %c0_i32_0 = arith.constant 0 : i32
    %c0_i32_1 = arith.constant 0 : i32
    return %c0_i32, %c0_i32_0 : i32, i32
  }
  func.func @transform_7(%arg0: i32) -> (i32, i32) {
    %c0_i32 = arith.constant 0 : i32
    %c0_i32_0 = arith.constant 0 : i32
    %c0_i32_1 = arith.constant 0 : i32
    return %c0_i32, %c0_i32_0 : i32, i32
  }
  func.func @transform_8(%arg0: i32) -> (i32, i32) {
    %c0_i32 = arith.constant 0 : i32
    %c0_i32_0 = arith.constant 0 : i32
    %c0_i32_1 = arith.constant 0 : i32
    return %c0_i32, %c0_i32_0 : i32, i32
  }
  func.func @transform_9(%arg0: i32) -> (i32, i32) {
    %c0_i32 = arith.constant 0 : i32
    %c0_i32_0 = arith.constant 0 : i32
    %c0_i32_1 = arith.constant 0 : i32
    return %c0_i32, %c0_i32_0 : i32, i32
  }
  func.func @transform_10(%arg0: i32) -> (i32, i32) {
    %c0_i32 = arith.constant 0 : i32
    %c0_i32_0 = arith.constant 0 : i32
    %c0_i32_1 = arith.constant 0 : i32
    return %c0_i32, %c0_i32_0 : i32, i32
  }
  func.func @transform_11(%arg0: i32) -> (i32, i32) {
    %c0_i32 = arith.constant 0 : i32
    %c0_i32_0 = arith.constant 0 : i32
    %c0_i32_1 = arith.constant 0 : i32
    return %c0_i32, %c0_i32_0 : i32, i32
  }
  func.func @transform_12(%arg0: i32) -> (i32, i32) {
    %c0_i32 = arith.constant 0 : i32
    %c0_i32_0 = arith.constant 0 : i32
    %c0_i32_1 = arith.constant 0 : i32
    return %c0_i32, %c0_i32_0 : i32, i32
  }
  func.func @transform_13(%arg0: i32) -> (i32, i32) {
    %c0_i32 = arith.constant 0 : i32
    %c0_i32_0 = arith.constant 0 : i32
    %c0_i32_1 = arith.constant 0 : i32
    return %c0_i32, %c0_i32_0 : i32, i32
  }
  func.func @transform_14(%arg0: i32) -> (i32, i32, i32) {
    %c0_i32 = arith.constant 0 : i32
    %c0_i32_0 = arith.constant 0 : i32
    %c0_i32_1 = arith.constant 0 : i32
    return %arg0, %c0_i32, %c0_i32_0 : i32, i32, i32
  }
  func.func @transform_15(%arg0: i32) -> (i32, i32, i32) {
    %c0_i32 = arith.constant 0 : i32
    %c0_i32_0 = arith.constant 0 : i32
    %c0_i32_1 = arith.constant 0 : i32
    return %arg0, %c0_i32, %c0_i32_0 : i32, i32, i32
  }
  func.func @transform_16(%arg0: i32) -> (i32, i32, i32) {
    %c0_i32 = arith.constant 0 : i32
    %c0_i32_0 = arith.constant 0 : i32
    %c0_i32_1 = arith.constant 0 : i32
    return %arg0, %c0_i32, %c0_i32_0 : i32, i32, i32
  }
}

</mosaic_0001>

<bundles_post_ra>
// kernel: tpu_custom_call.1
= control target key start
LH: loop header
LB: loop body
LE: loop exit
PB: predicated region body
PF: predicated region fallthrough
CT: control target
= control target key end

     0   :  { %s1903_s0 = inlined_call_operand.vmem [shape: f32[2,4,256], index: 0, kind: input, shape index: {}]   ;;  %s1904_s1 = inlined_call_operand.vmem [shape: bf16[2,16,64], index: 1, kind: input, shape index: {}]   ;;  %s1905_s2 = inlined_call_operand.vmem [shape: bf16[2,32,4], index: 2, kind: input, shape index: {}]   ;;  %s1906_s3 = inlined_call_operand.vmem [shape: bf16[2,16], index: 3, kind: input, shape index: {}]   ;;  %s1907_s4 = inlined_call_operand.vmem [shape: bf16[8,32], index: 4, kind: input, shape index: {}]   ;;  %s1908_s5 = inlined_call_operand.vmem [shape: f32[8,1], index: 5, kind: input, shape index: {}]   ;;  %s1909_s6 = inlined_call_operand.vmem [shape: bf16[4,8], index: 6, kind: input, shape index: {}]   ;;  %s1910_s7 = inlined_call_operand.vmem [shape: bf16[16,8], index: 7, kind: input, shape index: {}]   ;;  %s1911_s8 = inlined_call_operand.vmem [shape: bf16[8,16], index: 8, kind: input, shape index: {}]   ;;  %s1912_s9 = inlined_call_operand.<no memory space> [shape: f32[1,1], index: 9, kind: input, shape index: {}]   ;;  %s1913_s10 = inlined_call_operand.vmem [shape: bf16[8,16], index: 10, kind: input, shape index: {}]   ;;  %s1914_s11 = inlined_call_operand.vmem [shape: f32[8,256], index: 11, kind: input, shape index: {}]   ;;  %s1915_s12 = inlined_call_operand.vmem [shape: bf16[4,4], index: 12, kind: input, shape index: {}]   ;;  %s1916_s13 = inlined_call_operand.vmem [shape: f32[4,1], index: 13, kind: input, shape index: {}]   ;;  %s1917_s14 = inlined_call_operand.hbm [shape: f32[2,1,256], index: 14, kind: output, shape index: {0}]   ;;  %s1918_s15 = inlined_call_operand.hbm [shape: bf16[2,4,256], index: 15, kind: output, shape index: {1}]   ;;  %s1919_s16 = inlined_call_operand.vmem [shape: f32[2,4,2], index: 16, kind: output, shape index: {2}]  }
   0x1   :  { %1923 = sst [smem:[#allocation12_spill]] %s1903_s0  ;;  %v22_v0 = vstv %s1912_s9 }
   0x2   :  { %1924 = sst [smem:[#allocation13_spill]] %s1904_s1  ;;  %23 = vst [vmem:[#allocation2] sm:$0x1] %v22_v0 }
   0x3   :  { %1925 = sst [smem:[#allocation14_spill]] %s1905_s2 }
   0x4   :  { %1926 = sst [smem:[#allocation15_spill]] %s1906_s3 }
   0x5   :  { %1927 = sst [smem:[#allocation16_spill]] %s1907_s4 }
   0x6   :  { %1928 = sst [smem:[#allocation17_spill]] %s1908_s5 }
   0x7   :  { %1929 = sst [smem:[#allocation18_spill]] %s1909_s6 }
   0x8   :  { %24 = vsyncpa [#allocation4], 0 }
   0x9   :  { %26 = vsyncpa [#allocation4 + $0x1], 0 }
   0xa   :  { %27 = vsyncpa [#allocation6], 0 }
   0xb   :  { %29 = vsyncpa [#allocation6 + $0x1], 0  ;;  %s1667_s23 = smov 0   ;;  %s1669_s24 = smov 0  }
   0xc   :  { %s1671_s25 = smov 0   ;;  %s1673_s26 = smov 0  }
   0xd LB: > { %1930 = sst [smem:[#allocation9_spill]] %s1556_s25  ;;  %s1688_s9 = sadd.s32 4294967295, %s1560_s26   ;;  %s1560_s26 = sphi %s1673_s26, %s1942_s26   ;;  %s1556_s25 = sphi %s1671_s25, %s1944_s25   ;;  %s1552_s24 = sphi %s1669_s24, %s1946_s24   ;;  %s1548_s23 = sphi %s1667_s23, %s1945_s23  }
   0xe   : > { %s1306_s27 = sadd.s32 4294967294, %s1560_s26   ;;  %s1692_s28 = sadd.s32 1, %s1560_s26  }
   0xf   : > { %1931 = sst [smem:[#allocation10_spill]] %s1692_s28  ;;  %s351_s29 = sadd.s32 1, %s1556_s25 }
  0x10   : > { %s348_s30 = ssub.s32 %s1560_s26, %s1692_s28  ;;  %p361_p0 = scmp.ne.s32.totalorder %s1556_s25, %s1552_s24 }
  0x11   : > { %p349_p1 = scmp.eq.s32.totalorder %s348_s30, 0  ;;  %p362_p2 = scmp.eq.s32.totalorder %s1688_s9, 1 }
  0x12   : > { %p367_p3 = scmp.ne.s32.totalorder %s1552_s24, %s1548_s23  ;;  %p368_p4 = scmp.eq.s32.totalorder %s1306_s27, 1 }
  0x13   : > { %s1703_s0 = scalar_select %p349_p1, %s1556_s25, %s351_s29  }
  0x14   : > { %p1705_p5 = por %p362_p2, %p361_p0  ;;  %p1709_p6 = por %p368_p4, %p367_p3 }
  0x15   : > { %1932 = sst [smem:[#allocation11_spill]] %s1703_s0  ;;  %p1309_p7 = scmp.ge.s32.totalorder %s1560_s26, 1 }
  0x16   : > { %p495_p8 = scmp.lt.s32.totalorder %s1560_s26, 3 }
  0x18   : > { %p496_p9 = pnand %p1309_p7, %p495_p8 }
  0x19   : > { %p564_p10 = scmp.lt.s32.totalorder (!%p496_p9), %s1688_s9, 1  ;;  %v1562_v1 = vmov (!%p496_p9), 0.0   ;;  %s1935_s5 = sld [smem:[#allocation17_spill]] (!%p496_p9)  ;;  %vm1563_vm0 = vmmov (!%p496_p9), 0   ;;  %v1564_v3 = vmov (!%p496_p9), 0   ;;  %vm593_vm1 = vcmask (!%p496_p9), 130048  }
  0x1a   : > { %499 = sbr.rel (%p496_p9) target bundleno = 1826 (0x722), region = 76  ;;  %1360 = vmatprep.subr.bf16.mxu0 (!%p496_p9), %v1562_v1  ;;  %1366 = vmatprep.subr.bf16.mxu1 (!%p496_p9), %v1562_v1  ;;  %s1936_s1 = sld [smem:[#allocation13_spill]] (!%p496_p9)  ;;  %vm660_vm2 = vcmask (!%p496_p9), 261120   ;;  %vm710_vm3 = vcmask (!%p496_p9), 1041408   ;;  %vm706_vm4 = vcmask (!%p496_p9), 31744   ;;  %vm766_vm5 = vcmask (!%p496_p9), 1043456  }
  0x1b   : > { %1362 = vmatprep.mubr.msk.bf16.mxu0 (!%p496_p9), %vm1563_vm0, %v1562_v1  ;;  %1370 = vmatprep.mubr.msk.bf16.mxu1 (!%p496_p9), %vm1563_vm0, %v1562_v1  ;;  %s1937_s2 = sld [smem:[#allocation14_spill]] (!%p496_p9)  ;;  %s1938_s3 = sld [smem:[#allocation15_spill]] (!%p496_p9)  ;;  %v1327_v25 = vld [vmem:[#allocation2] ss:$0 sm:$0xff] (!%p496_p9)  ;;  %vm762_vm6 = vcmask (!%p496_p9), 64512   ;;  %vm838_vm7 = vcmask (!%p496_p9), 1045504  }
  0x1c   : > { %1457 = vset.pattern.permute.xlu0 (!%p496_p9), %v1564_v3  ;;  %s1939_s4 = sld [smem:[#allocation16_spill]] (!%p496_p9)  ;;  %s1940_s6 = sld [smem:[#allocation18_spill]] (!%p496_p9)  ;;  %v1461_v32 = vld [vmem:[%s1910_s7] sm:$0xff] (!%p496_p9)   ;;  %vm979_vm8 = vcmask (!%p496_p9), 392192   ;;  %vm981_vm9 = vcmask (!%p496_p9), 523264   ;;  %vm983_vm10 = vcmask (!%p496_p9), 654336  }
  0x1d   : > { %s1566_s29 = smov (!%p496_p9), 112   ;;  %s1567_s30 = smov (!%p496_p9), 104   ;;  %v847_v55 = vld [vmem:[%s1911_s8] sm:$0xf] (!%p496_p9)  ;;  %vm985_vm11 = vcmask (!%p496_p9), 785408   ;;  %vm987_vm12 = vcmask (!%p496_p9), 916480  }
  0x1e   : > { %s1569_s20 = smov (!%p496_p9), 88   ;;  %v908_v56 = vld [vmem:[%s1913_s10] sm:$0xf] (!%p496_p9)  ;;  %s1572_s25 = smov (!%p496_p9), 32  }
  0x1f   : > { %v642_v2 = vld [vmem:[%s1935_s5] sm:$0xff] (!%p496_p9)  ;;  %s1570_s5 = smov (!%p496_p9), 80   ;;  %v913_v57 = vsel (!%p496_p9), %vm766_vm5, %v908_v56, 0  ;;  %s1573_s28 = smov (!%p496_p9), 16  }
  0x20   : > { %645 = vperm.xlu0 (!%p496_p9), %1457, %v642_v2   ;;  %v1031_v56 = vld [vmem:[%s1915_s12] sm:$0x3] (!%p496_p9) }
  0x21   : > { %s1722_s21 = scalar_select %p564_p10, %s1688_s9, 1  ;;  %v584_v5 = vld [vmem:[%s1938_s3] sm:$0x1] }
  0x22   : > { %v637_v8 = vld [vmem:[%s1939_s4] sm:$0xf] }
  0x23   : > { %s1342_s22 = sshll.u32 %s1722_s21, 3  ;;  %s1344_s27 = sshll.u32 %s1722_s21, 4  ;;  %v705_v9 = vld [vmem:[%s1940_s6] sm:$0x3] }
  0x24   : > { %s573_s19 = scalar_lea.vmem %s1936_s1, %s1342_s22  ;;  %s578_s0 = scalar_lea.vmem %s1937_s2, %s1344_s27  ;;  %v712_v10 = vsel %vm710_vm3, %v705_v9, 0 }
  0x25   : > { %v1458_v4 = vld [vmem:[%s573_s19] sm:$0xff]   ;;  %v1460_v7 = vld [vmem:[%s578_s0 + $0x8] sm:$0xff]   ;;  %s1568_s19 = smov 96   ;;  %s1571_s27 = smov 72  }
  0x26   : > { %1361 = vmatpush3.bf16.msra.mxu0 %v1458_v4  ;;  %v1459_v6 = vld [vmem:[%s578_s0] sm:$0xff]   ;;  %s1565_s0 = smov 120   ;;  %s1577_s1 = smov [#allocation3]  }
  0x27   : > { %1374 = vmatprep.subr.bf16.mxu0 %v1562_v1  ;;  %1367 = vmatpush3.bf16.msra.mxu1 %v1459_v6  ;;  %s1470_s2 = sshll.u32 %s1577_s1, 4  ;;  %s1471_s2 = int_to_ptr.vmem [resolvable:$false] %s1470_s2 }
  0x28   : > { %1368 = vmatprep.subr.bf16.mxu1 %v1562_v1  ;;  %s1472_s3 = scalar_lea.vmem %s1471_s2, 64 }
  0x29   : > { %1363 = vmatmul.mubr.msk.bf16.vlgmr.msra.gmra.mrb[0].mxu0 %vm593_vm1, %v584_v5 }
  0x2a   : > { %1376 = vmatprep.mubr.msk.bf16.mxu0 %vm1563_vm0, %v1562_v1  ;;  %1375 = vmatpush3.bf16.msra.mxu0 %v712_v10  ;;  %v1037_v10 = vld [vmem:[%s1916_s13] sm:$0xf] }
  0x2b   : > { %1369 = vmatpush3.bf16.msra.mxu1 %v1460_v7  ;;  %1386 = vmatprep.subr.bf16.mxu0 %v1562_v1 }
  0x2c   : > { %1380 = vmatprep.subr.bf16.mxu1 %v1562_v1 }
  0x2e   : > { %1371 = vmatmul.mubr.msk.bf16.vlgmr.msra.gmra.mrb[0].mxu1 %vm660_vm2, %v637_v8 }
  0x2f   : > { %1382 = vmatprep.mubr.msk.bf16.mxu1 %vm1563_vm0, %v1562_v1 }
  0x9f   : > { %v646_v17 = vpop.permute.xlu0 %645 }
  0xfc   : > { %v631_v11 = vpop.f32.mrb[0].mxu0 }
  0xfd   : > { %v812_v12 = vrot.slane %v631_v11, 6  ;;  %v1364_v13 = vpop.f32.mrb[1].mxu0  ;;  %v816_v15 = vrot.slane %v631_v11, 4  ;;  %v820_v21 = vrot.slane %v631_v11, 2  ;;  %824 = vrot.lane.b32.xlu1 %v631_v11, %s1568_s19 }
  0xfe   : > { %v634_v14 = vpop.f32.mrb[2].mxu0 }
  0xff   : > { %813 = vrot.lane.b32.xlu0 %v812_v12, %s1565_s0  ;;  %v1365_v16 = vpop.f32.mrb[3].mxu0  ;;  %s1574_s0 = smov 64  }
 0x101   : > { %v698_v18 = vpop.f32.mrb[0].mxu1  ;;  %827 = vrot.lane.b32.xlu1 %v812_v12, %s1569_s20 }
 0x102   : > { %v699_v19 = vadd.f32 %v698_v18, %v646_v17  ;;  %v1372_v20 = vpop.f32.mrb[1].mxu1 }
 0x103   : > { %817 = vrot.lane.b32.xlu0 %v816_v15, %s1566_s29  ;;  %v701_v22 = vpop.f32.mrb[2].mxu1 }
 0x104   : > { %v704_v23 = vpack.c.bf16 %v699_v19, %v699_v19  ;;  %v1373_v24 = vpop.f32.mrb[3].mxu1  ;;  %v989_v22 = vld [vmem:[%s1914_s11] sm:$0xff] }
 0x105   : > { %830 = vrot.lane.b32.xlu1 %v816_v15, %s1570_s5 }
 0x106   : > { %1377 = vmatmul.mubr.msk.bf16.vlgmr.msra.gmra.mrb[4].mxu0 %vm706_vm4, %v704_v23  ;;  %v990_v23 = vld [vmem:[%s1914_s11 + $0x8] sm:$0xff] }
 0x107   : > { %821 = vrot.lane.b32.xlu0 %v820_v21, %s1567_s30  ;;  %1388 = vmatprep.mubr.msk.bf16.mxu0 %vm1563_vm0, %v1562_v1  ;;  %s1575_s30 = smov 48  }
 0x109   : > { %833 = vrot.lane.b32.xlu1 %v820_v21, %s1571_s27  ;;  %s1807_s27 = sand.u32 1, %s1552_s24  }
 0x10b   : > { %856 = vperm.xlu0 %1457, %v1327_v25  }
 0x16f   : > { %v825_v33 = vpop.permute.xlu1 %824 }
 0x171   : > { %v814_v34 = vpop.permute.xlu0 %813 }
 0x172   : > { %v836_v38 = vsel %vm710_vm3, %v631_v11, %v814_v34 }
 0x173   : > { %v828_v35 = vpop.permute.xlu1 %827 }
 0x174   : > { %v840_v39 = vsel %vm710_vm3, %v825_v33, %v828_v35  ;;  %v1576_v33 = vmov 1966171168   ;;  %v1011_v35 = vlaneseq }
 0x175   : > { %v818_v36 = vpop.permute.xlu0 %817  ;;  %v1009_v34 = vunpack.c.l.s4 %v1576_v33 }
 0x176   : > { %v837_v40 = vsel %vm766_vm5, %v836_v38, %v818_v36  ;;  %vm1025_vm13 = vcmp.lt.s32.totalorder %v1011_v35, 256 }
 0x177   : > { %v831_v37 = vpop.permute.xlu1 %830 }
 0x178   : > { %v841_v42 = vsel %vm766_vm5, %v840_v39, %v831_v37 }
 0x179   : > { %v822_v41 = vpop.permute.xlu0 %821 }
 0x17a   : > { %v839_v45 = vsel %vm838_vm7, %v837_v40, %v822_v41  ;;  %v1010_v40 = vunpack.c.0.s8 %v1009_v34  ;;  %v1012_v41 = vshrl.u32 %v1011_v35, 7 }
 0x17b   : > { %v834_v43 = vpop.permute.xlu1 %833 }
 0x17c   : > { %v842_v49 = vsel %vm838_vm7, %v841_v42, %v834_v43 }
 0x18a   : > { %v857_v58 = vpop.permute.xlu0 %856 }
 0x1d9   : > { %v748_v26 = vpop.f32.mrb[4].mxu0 }
 0x1da   : > { %v756_v27 = vpack.c.bf16 %v748_v26, %v748_v26  ;;  %v1378_v28 = vpop.f32.mrb[5].mxu0 }
 0x1db   : > { %v751_v29 = vpop.f32.mrb[6].mxu0 }
 0x1dc   : > { %v768_v30 = vsel %vm766_vm5, %v756_v27, 0  ;;  %v1379_v31 = vpop.f32.mrb[7].mxu0 }
 0x1dd   : > { %1381 = vmatpush3.bf16.msra.mxu1 %v768_v30 }
 0x1de   : > { %1392 = vmatprep.subr.bf16.mxu1 %v1562_v1 }
 0x1e0   : > { %1383 = vmatmul.mubr.msk.bf16.vlgmr.msra.gmra.mrb[4].mxu1 %vm762_vm6, %v1461_v32 }
 0x1e1   : > { %1394 = vmatprep.mubr.msk.bf16.mxu1 %vm1563_vm0, %v1562_v1  ;;  %1393 = vmatpush3.bf16.msra.mxu1 %v913_v57 }
 0x2b3   : > { %v804_v44 = vpop.f32.mrb[4].mxu1 }
 0x2b4   : > { %v843_v46 = vadd.f32 %v839_v45, %v804_v44  ;;  %v1384_v47 = vpop.f32.mrb[5].mxu1 }
 0x2b5   : > { %v807_v48 = vpop.f32.mrb[6].mxu1 }
 0x2b6   : > { %v844_v50 = vadd.f32 %v842_v49, %v807_v48  ;;  %v1385_v51 = vpop.f32.mrb[7].mxu1  ;;  %v845_v52 = vmax.f32 %v843_v46, 0.0  ;;  %v1013_v46 = vsub.s32 %v1010_v40, %v1012_v41 }
 0x2b8   : > { %v846_v53 = vmax.f32 %v844_v50, 0.0 }
 0x2ba   : > { %v848_v54 = vpack.c.bf16 %v846_v53, %v845_v52 }
 0x2bc   : > { %1387 = vmatpush3.bf16.msra.mxu0 %v848_v54 }
 0x2bf   : > { %1389 = vmatmul.mubr.msk.bf16.vlgmr.msra.gmra.mrb[8].mxu0 %vm593_vm1, %v847_v55 }
 0x2c0   : > { %1084 = vmatprep.mubr.bf16.mxu0 %v1564_v3 }
 0x392   : > { %v896_v59 = vpop.f32.mrb[8].mxu0 }
 0x393   : > { %v897_v60 = vadd.f32 %v896_v59, %v857_v58  ;;  %v1390_v61 = vpop.f32.mrb[9].mxu0 }
 0x394   : > { %v899_v62 = vpop.f32.mrb[10].mxu0 }
 0x395   : > { %v902_v63 = vsub.f32 0.0, %v897_v60  ;;  %v1391_v0 = vpop.f32.mrb[11].mxu0 }
 0x397   : > { %v903_v1 = vmul.f32 1.442695, %v902_v63 }
 0x399   : > { %1462 = vpow2.f32 %v903_v1 }
 0x3a3   : > { %v1463_v2 = vpop.eup %1462 }
 0x3a4   : > { %v905_v4 = vadd.f32 1.0, %v1463_v2 }
 0x3a6   : > { %1464 = vrcp.f32 %v905_v4 }
 0x3b0   : > { %v1465_v3 = vpop.eup %1464 }
 0x3b1   : > { %v907_v5 = vpack.c.bf16 %v1465_v3, %v1465_v3 }
 0x3b3   : > { %1395 = vmatmul.mubr.msk.bf16.vlgmr.msra.gmra.mrb[8].mxu1 %vm762_vm6, %v907_v5 }
 0x486   : > { %v949_v6 = vpop.f32.mrb[8].mxu1 }
 0x487   : > { %959 = vrot.lane.b32.xlu0 %v949_v6, %s1572_s25  ;;  %956 = vrot.lane.b32.xlu1 %v949_v6, %s1573_s28  ;;  %v1396_v7 = vpop.f32.mrb[9].mxu1  ;;  %s1311_s25 = sshll.u32 %s1807_s27, 2 }
 0x488   : > { %v952_v8 = vpop.f32.mrb[10].mxu1  ;;  %s1822_s28 = scalar_lea.vmem [#allocation5], %s1311_s25 }
 0x489   : > { %v1397_v9 = vpop.f32.mrb[11].mxu1 }
 0x48b   : > { %965 = vrot.lane.b32.xlu0 %v949_v6, %s1574_s0  ;;  %962 = vrot.lane.b32.xlu1 %v949_v6, %s1575_s30  ;;  %s1941_s30 = sld [smem:[#allocation12_spill]]  ;;  %s1345_s0 = sshll.u32 %s1688_s9, 5 }
 0x48f   : > { %971 = vrot.lane.b32.xlu0 %v949_v6, %s1568_s19  ;;  %968 = vrot.lane.b32.xlu1 %v949_v6, %s1570_s5  ;;  %s1310_s19 = sshll.u32 %s1807_s27, 1  ;;  %s1127_s5 = scalar_lea.sflag [#allocation4], %s1807_s27 }
 0x491   : > { %s568_s20 = scalar_lea.vmem %s1941_s30, %s1342_s22  ;;  %s1810_s22 = scalar_lea.vmem [#allocation3], %s1310_s19 }
 0x492   : > { %v1028_v47 = vld [vmem:[%s568_s20] sm:$0xff]  ;;  %s1150_s30 = sshll.u32 %s1810_s22, 4  ;;  %s1151_s30 = int_to_ptr.vmem [resolvable:$true] %s1150_s30 }
 0x493   : > { %1040 = vperm.xlu0 %1457, %v1037_v10   ;;  %974 = vrot.lane.b32.xlu1 %v949_v6, %s1566_s29  ;;  %s1836_s29 = scalar_lea.hbm %s1917_s14, %s1345_s0  ;;  %s1466_s25 = scalar_lea.vmem %s1151_s30, 32 }
 0x494   : > { %p1467_p11 = scmp.ne.s32.totalorder %s1151_s30, %s1466_s25  ;;  %p1473_p0 = scmp.lt.s32.totalorder %s1151_s30, %s1471_s2 }
 0x495   : > { %p1474_p1 = scmp.lt.s32.totalorder %s1472_s3, %s1466_s25 }
 0x496   : > { %p1468_p12 = pnand %p1467_p11, %p1705_p5 }
 0x497   : > { %p1475_p2 = por %p1474_p1, %p1473_p0 }
 0x498   : > { %p1469_p13 = pneg %p1468_p12 }
 0x49a   : > { %p1476_p3 = pnand %p1475_p2, %p1469_p13 }
 0x4f9   : > { %v960_v11 = vpop.permute.xlu0 %959  ;;  %v957_v12 = vpop.permute.xlu1 %956 }
 0x4fa   : > { %v977_v13 = vsel %vm593_vm1, %v949_v6, %v957_v12 }
 0x4fb   : > { %v978_v15 = vsel %vm660_vm2, %v977_v13, %v960_v11 }
 0x4fd   : > { %v966_v14 = vpop.permute.xlu0 %965  ;;  %v963_v16 = vpop.permute.xlu1 %962 }
 0x4fe   : > { %v980_v17 = vsel %vm979_vm8, %v978_v15, %v963_v16 }
 0x4ff   : > { %v982_v18 = vsel %vm981_vm9, %v980_v17, %v966_v14 }
 0x501   : > { %v969_v19 = vpop.permute.xlu1 %968  ;;  %v972_v20 = vpop.permute.xlu0 %971 }
 0x502   : > { %v984_v21 = vsel %vm983_vm10, %v982_v18, %v969_v19 }
 0x503   : > { %v986_v24 = vsel %vm985_vm11, %v984_v21, %v972_v20 }
 0x505   : > { %v975_v25 = vpop.permute.xlu1 %974 }
 0x506   : > { %v988_v26 = vsel %vm987_vm12, %v986_v24, %v975_v25 }
 0x507   : > { %v991_v27 = vmul.f32 %v989_v22, %v988_v26  ;;  %v992_v28 = vmul.f32 %v990_v23, %v988_v26 }
 0x509   : > { %v993_v29 = vrot.slane %v991_v27, 4  ;;  %v999_v30 = vrot.slane %v992_v28, 4 }
 0x50b   : > { %v994_v31 = vadd.f32 %v993_v29, %v991_v27  ;;  %v1000_v32 = vadd.f32 %v999_v30, %v992_v28 }
 0x50d   : > { %v995_v36 = vrot.slane %v994_v31, 2  ;;  %v1001_v37 = vrot.slane %v1000_v32, 2 }
 0x50f   : > { %v996_v38 = vadd.f32 %v995_v36, %v994_v31  ;;  %v1002_v39 = vadd.f32 %v1001_v37, %v1000_v32 }
 0x511   : > { %v997_v42 = vrot.slane %v996_v38, 1  ;;  %v1003_v43 = vrot.slane %v1002_v39, 1 }
 0x512   : > { %v1041_v57 = vpop.permute.xlu0 %1040 }
 0x513   : > { %v998_v44 = vadd.f32 %v997_v42, %v996_v38  ;;  %v1004_v45 = vadd.f32 %v1003_v43, %v1002_v39 }
 0x515   : > { %v1007_v48 = vcombine.low %v998_v44, %v1004_v45 }
 0x517   : > { %v1030_v49 = vmul.f32 %v1028_v47, %v1007_v48  ;;  %v1014_v50 = vrot.slane %v1007_v48, %v1013_v46 }
 0x519   : > { %v1033_v51 = vcombine.high %v1030_v49, %v1030_v49  ;;  %v1035_v52 = vpack.c.bf16 %v1030_v49, %v1030_v49  ;;  %v1021_v53 = vrot.slane %v1014_v50, %v1013_v46 }
 0x51b   : > { %v1036_v54 = vpack.c.bf16 %v1033_v51, %v1033_v51  ;;  %1027 = vst.msk [vmem:[%s1810_s22] sm:$0x3] %vm1025_vm13, %v1021_v53  ;;  %v1047_v55 = vsel %vm710_vm3, %v1035_v52, 0 }
 0x51d   : > { %1330 = vmatprep.subr.msk.bf16.mxu0 %vm710_vm3, %v1036_v54 }
 0x51e   : > { %1053 = vmatpush1.bf16.msra.mxu0 %v1047_v55 }
 0x521   : > { %1331 = vmatmul.mubr.msk.bf16.vlgmr.msra.gmra.mrb[12].mxu0 %vm706_vm4, %v1031_v56 }
 0x5f4   : > { %v1086_v58 = vpop.f32.mrb[12].mxu0 }
 0x5f5   : > { %v1087_v59 = vadd.f32 %v1086_v58, %v1041_v57  ;;  %v1088_v60 = vpop.f32.mrb[13].mxu0 }
 0x5f6   : > { %v1089_v61 = vadd.f32 %v1088_v60, %v1041_v57  ;;  %v1090_v62 = vpop.f32.mrb[14].mxu0 }
 0x5f7   : > { %v1091_v63 = vpop.f32.mrb[15].mxu0  ;;  %v1107_v0 = vsel %vm766_vm5, %v1087_v59, 0.0 }
 0x5f8   : > { %v1332_v1 = vpack.c.bf16 %v1089_v61, %v1087_v59  ;;  %v1108_v2 = vsel %vm766_vm5, %v1089_v61, 0.0 }
 0x5f9   : > { %v1109_v4 = vadd.f32 %v1108_v2, %v1107_v0 }
 0x5fa   : > { %1333 = vst.sshfl [vmem:[%s1822_s28] sm:$0x33 pattern:$0x76325410] %v1332_v1 }
 0x5fb   : > { %1110 = vadd.xlane.f32.xlu1 %v1109_v4 }
 0x688   : > { %v1111_v3 = vpop.xlane.xlu1 %1110 }
 0x689   : > { %v1825_v5 = vmul.f32 0.00390625, %v1111_v3 }
 0x68b   : > { %v1113_v6 = vsub.f32 %v1087_v59, %v1825_v5  ;;  %v1114_v7 = vsub.f32 %v1089_v61, %v1825_v5 }
 0x68d   : > { %v1115_v8 = vmul.f32 %v1113_v6, %v1113_v6  ;;  %v1116_v9 = vmul.f32 %v1114_v7, %v1114_v7 }
 0x68f   : > { %v1117_v10 = vsel %vm766_vm5, %v1115_v8, 0.0  ;;  %v1118_v11 = vsel %vm766_vm5, %v1116_v9, 0.0 }
 0x690   : > { %v1119_v12 = vadd.f32 %v1118_v11, %v1117_v10 }
 0x692   : > { %1120 = vadd.xlane.f32.xlu0 %v1119_v12 }
 0x693   : > { %1479 = shalt.err (!%p1476_p3)
}
 0x694   : > { %s1480_s22 = scalar_lea.hbm %s1836_s29, 32  ;;  %s1484_s1 = scalar_lea.hbm %s1917_s14, 64 }
 0x695   : > { %p1481_p4 = scmp.ne.s32.totalorder %s1836_s29, %s1480_s22  ;;  %p1485_p9 = scmp.lt.u32.totalorder %s1836_s29, %s1917_s14 }
 0x696   : > { %p1486_p10 = scmp.lt.u32.totalorder %s1484_s1, %s1480_s22  ;;  %p1488_p12 = scmp.lt.u32.totalorder %s1480_s22, %s1836_s29 }
 0x697   : > { %p1482_p7 = pnand %p1481_p4, %p1705_p5 }
 0x698   : > { %p1487_p11 = por %p1486_p10, %p1485_p9 }
 0x699   : > { %p1483_p8 = pneg %p1482_p7 }
 0x69a   : > { %p1489_p13 = por %p1488_p12, %p1487_p11 }
 0x69c   : > { %p1490_p0 = pnand %p1489_p13, %p1483_p8 }
 0x69e   : > { %1493 = shalt.err (!%p1490_p0)
}
 0x69f   : > { %1398 = dma.vmem_to_hbm [thread:$0]  (%p1705_p5), %s1151_s30, 32, %s1836_s29, %s1127_s5  }
 0x6a0   : > { %s1346_s3 = sshll.u32 %s1688_s9, 6  ;;  %s1164_s25 = sshll.u32 %s1822_s28, 4  ;;  %s1165_s25 = int_to_ptr.vmem [resolvable:$true] %s1164_s25 }
 0x6a1   : > { %s1861_s19 = scalar_lea.hbm %s1918_s15, %s1346_s3  ;;  %s1132_s22 = scalar_lea.sflag [#allocation6], %s1807_s27 }
 0x6a2   : > { %s1494_s1 = scalar_lea.vmem %s1165_s25, 64  ;;  %s1578_s2 = smov [#allocation5]  }
 0x6a3   : > { %p1495_p1 = scmp.ne.s32.totalorder %s1165_s25, %s1494_s1  ;;  %s1498_s4 = sshll.u32 %s1578_s2, 4  ;;  %s1499_s4 = int_to_ptr.vmem [resolvable:$false] %s1498_s4 }
 0x6a4   : > { %s1500_s6 = scalar_lea.vmem %s1499_s4, 128  ;;  %p1501_p4 = scmp.lt.s32.totalorder %s1165_s25, %s1499_s4 }
 0x6a5   : > { %p1496_p2 = pnand %p1495_p1, %p1705_p5  ;;  %p1502_p7 = scmp.lt.s32.totalorder %s1500_s6, %s1494_s1 }
 0x6a7   : > { %p1497_p3 = pneg %p1496_p2  ;;  %p1503_p8 = por %p1502_p7, %p1501_p4 }
 0x6a9   : > { %p1504_p9 = pnand %p1503_p8, %p1497_p3 }
 0x6ab   : > { %1507 = shalt.err (!%p1504_p9)
}
 0x6ac   : > { %s1508_s9 = scalar_lea.hbm %s1861_s19, 64  ;;  %s1512_s30 = scalar_lea.hbm %s1918_s15, 128 }
 0x6ad   : > { %p1509_p10 = scmp.ne.s32.totalorder %s1861_s19, %s1508_s9  ;;  %p1513_p13 = scmp.lt.u32.totalorder %s1861_s19, %s1918_s15 }
 0x6ae   : > { %p1514_p0 = scmp.lt.u32.totalorder %s1512_s30, %s1508_s9  ;;  %p1516_p2 = scmp.lt.u32.totalorder %s1508_s9, %s1861_s19 }
 0x6af   : > { %p1510_p11 = pnand %p1509_p10, %p1705_p5 }
 0x6b0   : > { %p1515_p1 = por %p1514_p0, %p1513_p13 }
 0x6b1   : > { %p1511_p12 = pneg %p1510_p11 }
 0x6b2   : > { %p1517_p3 = por %p1516_p2, %p1515_p1 }
 0x6b4   : > { %p1518_p4 = pnand %p1517_p3, %p1511_p12 }
 0x6b6   : > { %1521 = shalt.err (!%p1518_p4)
}
 0x6b7   : > { %1399 = dma.vmem_to_hbm [thread:$0]  (%p1705_p5), %s1165_s25, 64, %s1861_s19, %s1132_s22   ;;  %vm1122_vm14 = vcmask 7168   ;;  %vm1124_vm15 = vcmask 11264  }
 0x6b8   : > { %s1318_s6 = sshll.u32 %s1722_s21, 2 }
 0x6b9   : > { %s582_s0 = scalar_lea.vmem %s1919_s16, %s1318_s6 }
 0x71f   : > { %v1121_v13 = vpop.xlane.xlu0 %1120 }
 0x720   : > { %v1123_v14 = vsel %vm1122_vm14, %v1825_v5, %v1121_v13 }
 0x721   : > { %1125 = vst.msk [vmem:[%s582_s0] sm:$0xf] %vm1124_vm15, %v1123_v14 }
 0x722 PF: > { %p1409_p7 = scmp.ge.s32.totalorder %s1560_s26, 2  ;;  %s1179_s17 = sand.u32 1, %s1548_s23  }
 0x723   : > { %s1180_s25 = scalar_lea.sflag [#allocation4], %s1179_s17 }
 0x724   : > { %p1403_p8 = pnand %p1409_p7, %p1709_p6 }
 0x726   : > { %1539 = dma.done.wait (!%p1403_p8), %s1180_s25, 32  }
 0x727   : > { %1541 = vsyncadd (!%p1403_p8), %s1180_s25, 4294967264  ;;  %s1189_s21 = scalar_lea.sflag [#allocation6], %s1179_s17 }
 0x728   : > { %1543 = dma.done.wait (!%p1403_p8), %s1189_s21, 64  }
 0x729   : > { %1545 = vsyncadd (!%p1403_p8), %s1189_s21, 4294967232  ;;  %s1942_s26 = sld [smem:[#allocation10_spill]]  ;;  %s1943_s20 = sld [smem:[#allocation9_spill]] }
 0x72a   : > { %s1944_s25 = sld [smem:[#allocation11_spill]]  ;;  %s1945_s23 = smov %s1552_s24 }
 0x72f   : > { %p32_p5 = scmp.ge.s32.totalorder %s1942_s26, 4   ;;  %s1946_s24 = smov %s1943_s20 }
 0x731   :  { %34 = sbr.rel (!%p32_p5) target bundleno = 13 (0xd), region = 146 }
 0x738   :  { %1201 = vsyncpa [#allocation4], 1 }
 0x739   :  { %1203 = vsyncpa [#allocation4 + $0x1], 1 }
 0x73a   :  { %1204 = vsyncpa [#allocation6], 1 }
 0x73b   :  { %1206 = vsyncpa [#allocation6 + $0x1], 1 }

// kernel: tpu_custom_call.1
= control target key start
LH: loop header
LB: loop body
LE: loop exit
PB: predicated region body
PF: predicated region fallthrough
CT: control target
= control target key end

     0   :  { %s1903_s0 = inlined_call_operand.vmem [shape: f32[2,4,256], index: 0, kind: input, shape index: {}]   ;;  %s1904_s1 = inlined_call_operand.vmem [shape: bf16[2,16,64], index: 1, kind: input, shape index: {}]   ;;  %s1905_s2 = inlined_call_operand.vmem [shape: bf16[2,32,4], index: 2, kind: input, shape index: {}]   ;;  %s1906_s3 = inlined_call_operand.vmem [shape: bf16[2,16], index: 3, kind: input, shape index: {}]   ;;  %s1907_s4 = inlined_call_operand.vmem [shape: bf16[8,32], index: 4, kind: input, shape index: {}]   ;;  %s1908_s5 = inlined_call_operand.vmem [shape: f32[8,1], index: 5, kind: input, shape index: {}]   ;;  %s1909_s6 = inlined_call_operand.vmem [shape: bf16[4,8], index: 6, kind: input, shape index: {}]   ;;  %s1910_s7 = inlined_call_operand.vmem [shape: bf16[16,8], index: 7, kind: input, shape index: {}]   ;;  %s1911_s8 = inlined_call_operand.vmem [shape: bf16[8,16], index: 8, kind: input, shape index: {}]   ;;  %s1912_s9 = inlined_call_operand.<no memory space> [shape: f32[1,1], index: 9, kind: input, shape index: {}]   ;;  %s1913_s10 = inlined_call_operand.vmem [shape: bf16[8,16], index: 10, kind: input, shape index: {}]   ;;  %s1914_s11 = inlined_call_operand.vmem [shape: f32[8,256], index: 11, kind: input, shape index: {}]   ;;  %s1915_s12 = inlined_call_operand.vmem [shape: bf16[4,4], index: 12, kind: input, shape index: {}]   ;;  %s1916_s13 = inlined_call_operand.vmem [shape: f32[4,1], index: 13, kind: input, shape index: {}]   ;;  %s1917_s14 = inlined_call_operand.hbm [shape: f32[2,1,256], index: 14, kind: output, shape index: {0}]   ;;  %s1918_s15 = inlined_call_operand.hbm [shape: bf16[2,4,256], index: 15, kind: output, shape index: {1}]   ;;  %s1919_s16 = inlined_call_operand.vmem [shape: f32[2,4,2], index: 16, kind: output, shape index: {2}]  }
   0x1   :  { %1923 = sst [smem:[#allocation12_spill]] %s1903_s0  ;;  %v22_v0 = vstv %s1912_s9 }
   0x2   :  { %1924 = sst [smem:[#allocation13_spill]] %s1904_s1  ;;  %23 = vst [vmem:[#allocation2] sm:$0x1] %v22_v0 }
   0x3   :  { %1925 = sst [smem:[#allocation14_spill]] %s1905_s2 }
   0x4   :  { %1926 = sst [smem:[#allocation15_spill]] %s1906_s3 }
   0x5   :  { %1927 = sst [smem:[#allocation16_spill]] %s1907_s4 }
   0x6   :  { %1928 = sst [smem:[#allocation17_spill]] %s1908_s5 }
   0x7   :  { %1929 = sst [smem:[#allocation18_spill]] %s1909_s6 }
   0x8   :  { %24 = vsyncpa [#allocation4], 0 }
   0x9   :  { %26 = vsyncpa [#allocation4 + $0x1], 0 }
   0xa   :  { %27 = vsyncpa [#allocation6], 0 }
   0xb   :  { %29 = vsyncpa [#allocation6 + $0x1], 0  ;;  %s1667_s23 = smov 0   ;;  %s1669_s24 = smov 0  }
   0xc   :  { %s1671_s25 = smov 0   ;;  %s1673_s26 = smov 0  }
   0xd LB: > { %1930 = sst [smem:[#allocation9_spill]] %s1556_s25  ;;  %s1688_s9 = sadd.s32 4294967295, %s1560_s26   ;;  %s1560_s26 = sphi %s1673_s26, %s1942_s26   ;;  %s1556_s25 = sphi %s1671_s25, %s1944_s25   ;;  %s1552_s24 = sphi %s1669_s24, %s1946_s24   ;;  %s1548_s23 = sphi %s1667_s23, %s1945_s23  }
   0xe   : > { %s1306_s27 = sadd.s32 4294967294, %s1560_s26   ;;  %s1692_s28 = sadd.s32 1, %s1560_s26  }
   0xf   : > { %1931 = sst [smem:[#allocation10_spill]] %s1692_s28  ;;  %s351_s29 = sadd.s32 1, %s1556_s25 }
  0x10   : > { %s348_s30 = ssub.s32 %s1560_s26, %s1692_s28  ;;  %p361_p0 = scmp.ne.s32.totalorder %s1556_s25, %s1552_s24 }
  0x11   : > { %p349_p1 = scmp.eq.s32.totalorder %s348_s30, 0  ;;  %p362_p2 = scmp.eq.s32.totalorder %s1688_s9, 1 }
  0x12   : > { %p367_p3 = scmp.ne.s32.totalorder %s1552_s24, %s1548_s23  ;;  %p368_p4 = scmp.eq.s32.totalorder %s1306_s27, 1 }
  0x13   : > { %s1703_s0 = scalar_select %p349_p1, %s1556_s25, %s351_s29  }
  0x14   : > { %p1705_p5 = por %p362_p2, %p361_p0  ;;  %p1709_p6 = por %p368_p4, %p367_p3 }
  0x15   : > { %1932 = sst [smem:[#allocation11_spill]] %s1703_s0  ;;  %p1309_p7 = scmp.ge.s32.totalorder %s1560_s26, 1 }
  0x16   : > { %p495_p8 = scmp.lt.s32.totalorder %s1560_s26, 3 }
  0x18   : > { %p496_p9 = pnand %p1309_p7, %p495_p8 }
  0x19   : > { %p564_p10 = scmp.lt.s32.totalorder (!%p496_p9), %s1688_s9, 1  ;;  %v1562_v1 = vmov (!%p496_p9), 0.0   ;;  %s1935_s5 = sld [smem:[#allocation17_spill]] (!%p496_p9)  ;;  %vm1563_vm0 = vmmov (!%p496_p9), 0   ;;  %v1564_v3 = vmov (!%p496_p9), 0   ;;  %vm593_vm1 = vcmask (!%p496_p9), 130048  }
  0x1a   : > { %499 = sbr.rel (%p496_p9) target bundleno = 1826 (0x722), region = 76  ;;  %1360 = vmatprep.subr.bf16.mxu0 (!%p496_p9), %v1562_v1  ;;  %1366 = vmatprep.subr.bf16.mxu1 (!%p496_p9), %v1562_v1  ;;  %s1936_s1 = sld [smem:[#allocation13_spill]] (!%p496_p9)  ;;  %vm660_vm2 = vcmask (!%p496_p9), 261120   ;;  %vm710_vm3 = vcmask (!%p496_p9), 1041408   ;;  %vm706_vm4 = vcmask (!%p496_p9), 31744   ;;  %vm766_vm5 = vcmask (!%p496_p9), 1043456  }
  0x1b   : > { %1362 = vmatprep.mubr.msk.bf16.mxu0 (!%p496_p9), %vm1563_vm0, %v1562_v1  ;;  %1370 = vmatprep.mubr.msk.bf16.mxu1 (!%p496_p9), %vm1563_vm0, %v1562_v1  ;;  %s1937_s2 = sld [smem:[#allocation14_spill]] (!%p496_p9)  ;;  %s1938_s3 = sld [smem:[#allocation15_spill]] (!%p496_p9)  ;;  %v1327_v25 = vld [vmem:[#allocation2] ss:$0 sm:$0xff] (!%p496_p9)  ;;  %vm762_vm6 = vcmask (!%p496_p9), 64512   ;;  %vm838_vm7 = vcmask (!%p496_p9), 1045504  }
  0x1c   : > { %1457 = vset.pattern.permute.xlu0 (!%p496_p9), %v1564_v3  ;;  %s1939_s4 = sld [smem:[#allocation16_spill]] (!%p496_p9)  ;;  %s1940_s6 = sld [smem:[#allocation18_spill]] (!%p496_p9)  ;;  %v1461_v32 = vld [vmem:[%s1910_s7] sm:$0xff] (!%p496_p9)   ;;  %vm979_vm8 = vcmask (!%p496_p9), 392192   ;;  %vm981_vm9 = vcmask (!%p496_p9), 523264   ;;  %vm983_vm10 = vcmask (!%p496_p9), 654336  }
  0x1d   : > { %s1566_s29 = smov (!%p496_p9), 112   ;;  %s1567_s30 = smov (!%p496_p9), 104   ;;  %v847_v55 = vld [vmem:[%s1911_s8] sm:$0xf] (!%p496_p9)  ;;  %vm985_vm11 = vcmask (!%p496_p9), 785408   ;;  %vm987_vm12 = vcmask (!%p496_p9), 916480  }
  0x1e   : > { %s1569_s20 = smov (!%p496_p9), 88   ;;  %v908_v56 = vld [vmem:[%s1913_s10] sm:$0xf] (!%p496_p9)  ;;  %s1572_s25 = smov (!%p496_p9), 32  }
  0x1f   : > { %v642_v2 = vld [vmem:[%s1935_s5] sm:$0xff] (!%p496_p9)  ;;  %s1570_s5 = smov (!%p496_p9), 80   ;;  %v913_v57 = vsel (!%p496_p9), %vm766_vm5, %v908_v56, 0  ;;  %s1573_s28 = smov (!%p496_p9), 16  }
  0x20   : > { %645 = vperm.xlu0 (!%p496_p9), %1457, %v642_v2   ;;  %v1031_v56 = vld [vmem:[%s1915_s12] sm:$0x3] (!%p496_p9) }
  0x21   : > { %s1722_s21 = scalar_select %p564_p10, %s1688_s9, 1  ;;  %v584_v5 = vld [vmem:[%s1938_s3] sm:$0x1] }
  0x22   : > { %v637_v8 = vld [vmem:[%s1939_s4] sm:$0xf] }
  0x23   : > { %s1342_s22 = sshll.u32 %s1722_s21, 3  ;;  %s1344_s27 = sshll.u32 %s1722_s21, 4  ;;  %v705_v9 = vld [vmem:[%s1940_s6] sm:$0x3] }
  0x24   : > { %s573_s19 = scalar_lea.vmem %s1936_s1, %s1342_s22  ;;  %s578_s0 = scalar_lea.vmem %s1937_s2, %s1344_s27  ;;  %v712_v10 = vsel %vm710_vm3, %v705_v9, 0 }
  0x25   : > { %v1458_v4 = vld [vmem:[%s573_s19] sm:$0xff]   ;;  %v1460_v7 = vld [vmem:[%s578_s0 + $0x8] sm:$0xff]   ;;  %s1568_s19 = smov 96   ;;  %s1571_s27 = smov 72  }
  0x26   : > { %1361 = vmatpush3.bf16.msra.mxu0 %v1458_v4  ;;  %v1459_v6 = vld [vmem:[%s578_s0] sm:$0xff]   ;;  %s1565_s0 = smov 120   ;;  %s1577_s1 = smov [#allocation3]  }
  0x27   : > { %1374 = vmatprep.subr.bf16.mxu0 %v1562_v1  ;;  %1367 = vmatpush3.bf16.msra.mxu1 %v1459_v6  ;;  %s1470_s2 = sshll.u32 %s1577_s1, 4  ;;  %s1471_s2 = int_to_ptr.vmem [resolvable:$false] %s1470_s2 }
  0x28   : > { %1368 = vmatprep.subr.bf16.mxu1 %v1562_v1  ;;  %s1472_s3 = scalar_lea.vmem %s1471_s2, 64 }
  0x29   : > { %1363 = vmatmul.mubr.msk.bf16.vlgmr.msra.gmra.mrb[0].mxu0 %vm593_vm1, %v584_v5 }
  0x2a   : > { %1376 = vmatprep.mubr.msk.bf16.mxu0 %vm1563_vm0, %v1562_v1  ;;  %1375 = vmatpush3.bf16.msra.mxu0 %v712_v10  ;;  %v1037_v10 = vld [vmem:[%s1916_s13] sm:$0xf] }
  0x2b   : > { %1369 = vmatpush3.bf16.msra.mxu1 %v1460_v7  ;;  %1386 = vmatprep.subr.bf16.mxu0 %v1562_v1 }
  0x2c   : > { %1380 = vmatprep.subr.bf16.mxu1 %v1562_v1 }
  0x2e   : > { %1371 = vmatmul.mubr.msk.bf16.vlgmr.msra.gmra.mrb[0].mxu1 %vm660_vm2, %v637_v8 }
  0x2f   : > { %1382 = vmatprep.mubr.msk.bf16.mxu1 %vm1563_vm0, %v1562_v1 }
  0x9f   : > { %v646_v17 = vpop.permute.xlu0 %645 }
  0xfc   : > { %v631_v11 = vpop.f32.mrb[0].mxu0 }
  0xfd   : > { %v812_v12 = vrot.slane %v631_v11, 6  ;;  %v1364_v13 = vpop.f32.mrb[1].mxu0  ;;  %v816_v15 = vrot.slane %v631_v11, 4  ;;  %v820_v21 = vrot.slane %v631_v11, 2  ;;  %824 = vrot.lane.b32.xlu1 %v631_v11, %s1568_s19 }
  0xfe   : > { %v634_v14 = vpop.f32.mrb[2].mxu0 }
  0xff   : > { %813 = vrot.lane.b32.xlu0 %v812_v12, %s1565_s0  ;;  %v1365_v16 = vpop.f32.mrb[3].mxu0  ;;  %s1574_s0 = smov 64  }
 0x101   : > { %v698_v18 = vpop.f32.mrb[0].mxu1  ;;  %827 = vrot.lane.b32.xlu1 %v812_v12, %s1569_s20 }
 0x102   : > { %v699_v19 = vadd.f32 %v698_v18, %v646_v17  ;;  %v1372_v20 = vpop.f32.mrb[1].mxu1 }
 0x103   : > { %817 = vrot.lane.b32.xlu0 %v816_v15, %s1566_s29  ;;  %v701_v22 = vpop.f32.mrb[2].mxu1 }
 0x104   : > { %v704_v23 = vpack.c.bf16 %v699_v19, %v699_v19  ;;  %v1373_v24 = vpop.f32.mrb[3].mxu1  ;;  %v989_v22 = vld [vmem:[%s1914_s11] sm:$0xff] }
 0x105   : > { %830 = vrot.lane.b32.xlu1 %v816_v15, %s1570_s5 }
 0x106   : > { %1377 = vmatmul.mubr.msk.bf16.vlgmr.msra.gmra.mrb[4].mxu0 %vm706_vm4, %v704_v23  ;;  %v990_v23 = vld [vmem:[%s1914_s11 + $0x8] sm:$0xff] }
 0x107   : > { %821 = vrot.lane.b32.xlu0 %v820_v21, %s1567_s30  ;;  %1388 = vmatprep.mubr.msk.bf16.mxu0 %vm1563_vm0, %v1562_v1  ;;  %s1575_s30 = smov 48  }
 0x109   : > { %833 = vrot.lane.b32.xlu1 %v820_v21, %s1571_s27  ;;  %s1807_s27 = sand.u32 1, %s1552_s24  }
 0x10b   : > { %856 = vperm.xlu0 %1457, %v1327_v25  }
 0x16f   : > { %v825_v33 = vpop.permute.xlu1 %824 }
 0x171   : > { %v814_v34 = vpop.permute.xlu0 %813 }
 0x172   : > { %v836_v38 = vsel %vm710_vm3, %v631_v11, %v814_v34 }
 0x173   : > { %v828_v35 = vpop.permute.xlu1 %827 }
 0x174   : > { %v840_v39 = vsel %vm710_vm3, %v825_v33, %v828_v35  ;;  %v1576_v33 = vmov 1966171168   ;;  %v1011_v35 = vlaneseq }
 0x175   : > { %v818_v36 = vpop.permute.xlu0 %817  ;;  %v1009_v34 = vunpack.c.l.s4 %v1576_v33 }
 0x176   : > { %v837_v40 = vsel %vm766_vm5, %v836_v38, %v818_v36  ;;  %vm1025_vm13 = vcmp.lt.s32.totalorder %v1011_v35, 256 }
 0x177   : > { %v831_v37 = vpop.permute.xlu1 %830 }
 0x178   : > { %v841_v42 = vsel %vm766_vm5, %v840_v39, %v831_v37 }
 0x179   : > { %v822_v41 = vpop.permute.xlu0 %821 }
 0x17a   : > { %v839_v45 = vsel %vm838_vm7, %v837_v40, %v822_v41  ;;  %v1010_v40 = vunpack.c.0.s8 %v1009_v34  ;;  %v1012_v41 = vshrl.u32 %v1011_v35, 7 }
 0x17b   : > { %v834_v43 = vpop.permute.xlu1 %833 }
 0x17c   : > { %v842_v49 = vsel %vm838_vm7, %v841_v42, %v834_v43 }
 0x18a   : > { %v857_v58 = vpop.permute.xlu0 %856 }
 0x1d9   : > { %v748_v26 = vpop.f32.mrb[4].mxu0 }
 0x1da   : > { %v756_v27 = vpack.c.bf16 %v748_v26, %v748_v26  ;;  %v1378_v28 = vpop.f32.mrb[5].mxu0 }
 0x1db   : > { %v751_v29 = vpop.f32.mrb[6].mxu0 }
 0x1dc   : > { %v768_v30 = vsel %vm766_vm5, %v756_v27, 0  ;;  %v1379_v31 = vpop.f32.mrb[7].mxu0 }
 0x1dd   : > { %1381 = vmatpush3.bf16.msra.mxu1 %v768_v30 }
 0x1de   : > { %1392 = vmatprep.subr.bf16.mxu1 %v1562_v1 }
 0x1e0   : > { %1383 = vmatmul.mubr.msk.bf16.vlgmr.msra.gmra.mrb[4].mxu1 %vm762_vm6, %v1461_v32 }
 0x1e1   : > { %1394 = vmatprep.mubr.msk.bf16.mxu1 %vm1563_vm0, %v1562_v1  ;;  %1393 = vmatpush3.bf16.msra.mxu1 %v913_v57 }
 0x2b3   : > { %v804_v44 = vpop.f32.mrb[4].mxu1 }
 0x2b4   : > { %v843_v46 = vadd.f32 %v839_v45, %v804_v44  ;;  %v1384_v47 = vpop.f32.mrb[5].mxu1 }
 0x2b5   : > { %v807_v48 = vpop.f32.mrb[6].mxu1 }
 0x2b6   : > { %v844_v50 = vadd.f32 %v842_v49, %v807_v48  ;;  %v1385_v51 = vpop.f32.mrb[7].mxu1  ;;  %v845_v52 = vmax.f32 %v843_v46, 0.0  ;;  %v1013_v46 = vsub.s32 %v1010_v40, %v1012_v41 }
 0x2b8   : > { %v846_v53 = vmax.f32 %v844_v50, 0.0 }
 0x2ba   : > { %v848_v54 = vpack.c.bf16 %v846_v53, %v845_v52 }
 0x2bc   : > { %1387 = vmatpush3.bf16.msra.mxu0 %v848_v54 }
 0x2bf   : > { %1389 = vmatmul.mubr.msk.bf16.vlgmr.msra.gmra.mrb[8].mxu0 %vm593_vm1, %v847_v55 }
 0x2c0   : > { %1084 = vmatprep.mubr.bf16.mxu0 %v1564_v3 }
 0x392   : > { %v896_v59 = vpop.f32.mrb[8].mxu0 }
 0x393   : > { %v897_v60 = vadd.f32 %v896_v59, %v857_v58  ;;  %v1390_v61 = vpop.f32.mrb[9].mxu0 }
 0x394   : > { %v899_v62 = vpop.f32.mrb[10].mxu0 }
 0x395   : > { %v902_v63 = vsub.f32 0.0, %v897_v60  ;;  %v1391_v0 = vpop.f32.mrb[11].mxu0 }
 0x397   : > { %v903_v1 = vmul.f32 1.442695, %v902_v63 }
 0x399   : > { %1462 = vpow2.f32 %v903_v1 }
 0x3a3   : > { %v1463_v2 = vpop.eup %1462 }
 0x3a4   : > { %v905_v4 = vadd.f32 1.0, %v1463_v2 }
 0x3a6   : > { %1464 = vrcp.f32 %v905_v4 }
 0x3b0   : > { %v1465_v3 = vpop.eup %1464 }
 0x3b1   : > { %v907_v5 = vpack.c.bf16 %v1465_v3, %v1465_v3 }
 0x3b3   : > { %1395 = vmatmul.mubr.msk.bf16.vlgmr.msra.gmra.mrb[8].mxu1 %vm762_vm6, %v907_v5 }
 0x486   : > { %v949_v6 = vpop.f32.mrb[8].mxu1 }
 0x487   : > { %959 = vrot.lane.b32.xlu0 %v949_v6, %s1572_s25  ;;  %956 = vrot.lane.b32.xlu1 %v949_v6, %s1573_s28  ;;  %v1396_v7 = vpop.f32.mrb[9].mxu1  ;;  %s1311_s25 = sshll.u32 %s1807_s27, 2 }
 0x488   : > { %v952_v8 = vpop.f32.mrb[10].mxu1  ;;  %s1822_s28 = scalar_lea.vmem [#allocation5], %s1311_s25 }
 0x489   : > { %v1397_v9 = vpop.f32.mrb[11].mxu1 }
 0x48b   : > { %965 = vrot.lane.b32.xlu0 %v949_v6, %s1574_s0  ;;  %962 = vrot.lane.b32.xlu1 %v949_v6, %s1575_s30  ;;  %s1941_s30 = sld [smem:[#allocation12_spill]]  ;;  %s1345_s0 = sshll.u32 %s1688_s9, 5 }
 0x48f   : > { %971 = vrot.lane.b32.xlu0 %v949_v6, %s1568_s19  ;;  %968 = vrot.lane.b32.xlu1 %v949_v6, %s1570_s5  ;;  %s1310_s19 = sshll.u32 %s1807_s27, 1  ;;  %s1127_s5 = scalar_lea.sflag [#allocation4], %s1807_s27 }
 0x491   : > { %s568_s20 = scalar_lea.vmem %s1941_s30, %s1342_s22  ;;  %s1810_s22 = scalar_lea.vmem [#allocation3], %s1310_s19 }
 0x492   : > { %v1028_v47 = vld [vmem:[%s568_s20] sm:$0xff]  ;;  %s1150_s30 = sshll.u32 %s1810_s22, 4  ;;  %s1151_s30 = int_to_ptr.vmem [resolvable:$true] %s1150_s30 }
 0x493   : > { %1040 = vperm.xlu0 %1457, %v1037_v10   ;;  %974 = vrot.lane.b32.xlu1 %v949_v6, %s1566_s29  ;;  %s1836_s29 = scalar_lea.hbm %s1917_s14, %s1345_s0  ;;  %s1466_s25 = scalar_lea.vmem %s1151_s30, 32 }
 0x494   : > { %p1467_p11 = scmp.ne.s32.totalorder %s1151_s30, %s1466_s25  ;;  %p1473_p0 = scmp.lt.s32.totalorder %s1151_s30, %s1471_s2 }
 0x495   : > { %p1474_p1 = scmp.lt.s32.totalorder %s1472_s3, %s1466_s25 }
 0x496   : > { %p1468_p12 = pnand %p1467_p11, %p1705_p5 }
 0x497   : > { %p1475_p2 = por %p1474_p1, %p1473_p0 }
 0x498   : > { %p1469_p13 = pneg %p1468_p12 }
 0x49a   : > { %p1476_p3 = pnand %p1475_p2, %p1469_p13 }
 0x4f9   : > { %v960_v11 = vpop.permute.xlu0 %959  ;;  %v957_v12 = vpop.permute.xlu1 %956 }
 0x4fa   : > { %v977_v13 = vsel %vm593_vm1, %v949_v6, %v957_v12 }
 0x4fb   : > { %v978_v15 = vsel %vm660_vm2, %v977_v13, %v960_v11 }
 0x4fd   : > { %v966_v14 = vpop.permute.xlu0 %965  ;;  %v963_v16 = vpop.permute.xlu1 %962 }
 0x4fe   : > { %v980_v17 = vsel %vm979_vm8, %v978_v15, %v963_v16 }
 0x4ff   : > { %v982_v18 = vsel %vm981_vm9, %v980_v17, %v966_v14 }
 0x501   : > { %v969_v19 = vpop.permute.xlu1 %968  ;;  %v972_v20 = vpop.permute.xlu0 %971 }
 0x502   : > { %v984_v21 = vsel %vm983_vm10, %v982_v18, %v969_v19 }
 0x503   : > { %v986_v24 = vsel %vm985_vm11, %v984_v21, %v972_v20 }
 0x505   : > { %v975_v25 = vpop.permute.xlu1 %974 }
 0x506   : > { %v988_v26 = vsel %vm987_vm12, %v986_v24, %v975_v25 }
 0x507   : > { %v991_v27 = vmul.f32 %v989_v22, %v988_v26  ;;  %v992_v28 = vmul.f32 %v990_v23, %v988_v26 }
 0x509   : > { %v993_v29 = vrot.slane %v991_v27, 4  ;;  %v999_v30 = vrot.slane %v992_v28, 4 }
 0x50b   : > { %v994_v31 = vadd.f32 %v993_v29, %v991_v27  ;;  %v1000_v32 = vadd.f32 %v999_v30, %v992_v28 }
 0x50d   : > { %v995_v36 = vrot.slane %v994_v31, 2  ;;  %v1001_v37 = vrot.slane %v1000_v32, 2 }
 0x50f   : > { %v996_v38 = vadd.f32 %v995_v36, %v994_v31  ;;  %v1002_v39 = vadd.f32 %v1001_v37, %v1000_v32 }
 0x511   : > { %v997_v42 = vrot.slane %v996_v38, 1  ;;  %v1003_v43 = vrot.slane %v1002_v39, 1 }
 0x512   : > { %v1041_v57 = vpop.permute.xlu0 %1040 }
 0x513   : > { %v998_v44 = vadd.f32 %v997_v42, %v996_v38  ;;  %v1004_v45 = vadd.f32 %v1003_v43, %v1002_v39 }
 0x515   : > { %v1007_v48 = vcombine.low %v998_v44, %v1004_v45 }
 0x517   : > { %v1030_v49 = vmul.f32 %v1028_v47, %v1007_v48  ;;  %v1014_v50 = vrot.slane %v1007_v48, %v1013_v46 }
 0x519   : > { %v1033_v51 = vcombine.high %v1030_v49, %v1030_v49  ;;  %v1035_v52 = vpack.c.bf16 %v1030_v49, %v1030_v49  ;;  %v1021_v53 = vrot.slane %v1014_v50, %v1013_v46 }
 0x51b   : > { %v1036_v54 = vpack.c.bf16 %v1033_v51, %v1033_v51  ;;  %1027 = vst.msk [vmem:[%s1810_s22] sm:$0x3] %vm1025_vm13, %v1021_v53  ;;  %v1047_v55 = vsel %vm710_vm3, %v1035_v52, 0 }
 0x51d   : > { %1330 = vmatprep.subr.msk.bf16.mxu0 %vm710_vm3, %v1036_v54 }
 0x51e   : > { %1053 = vmatpush1.bf16.msra.mxu0 %v1047_v55 }
 0x521   : > { %1331 = vmatmul.mubr.msk.bf16.vlgmr.msra.gmra.mrb[12].mxu0 %vm706_vm4, %v1031_v56 }
 0x5f4   : > { %v1086_v58 = vpop.f32.mrb[12].mxu0 }
 0x5f5   : > { %v1087_v59 = vadd.f32 %v1086_v58, %v1041_v57  ;;  %v1088_v60 = vpop.f32.mrb[13].mxu0 }
 0x5f6   : > { %v1089_v61 = vadd.f32 %v1088_v60, %v1041_v57  ;;  %v1090_v62 = vpop.f32.mrb[14].mxu0 }
 0x5f7   : > { %v1091_v63 = vpop.f32.mrb[15].mxu0  ;;  %v1107_v0 = vsel %vm766_vm5, %v1087_v59, 0.0 }
 0x5f8   : > { %v1332_v1 = vpack.c.bf16 %v1089_v61, %v1087_v59  ;;  %v1108_v2 = vsel %vm766_vm5, %v1089_v61, 0.0 }
 0x5f9   : > { %v1109_v4 = vadd.f32 %v1108_v2, %v1107_v0 }
 0x5fa   : > { %1333 = vst.sshfl [vmem:[%s1822_s28] sm:$0x33 pattern:$0x76325410] %v1332_v1 }
 0x5fb   : > { %1110 = vadd.xlane.f32.xlu1 %v1109_v4 }
 0x688   : > { %v1111_v3 = vpop.xlane.xlu1 %1110 }
 0x689   : > { %v1825_v5 = vmul.f32 0.00390625, %v1111_v3 }
 0x68b   : > { %v1113_v6 = vsub.f32 %v1087_v59, %v1825_v5  ;;  %v1114_v7 = vsub.f32 %v1089_v61, %v1825_v5 }
 0x68d   : > { %v1115_v8 = vmul.f32 %v1113_v6, %v1113_v6  ;;  %v1116_v9 = vmul.f32 %v1114_v7, %v1114_v7 }
 0x68f   : > { %v1117_v10 = vsel %vm766_vm5, %v1115_v8, 0.0  ;;  %v1118_v11 = vsel %vm766_vm5, %v1116_v9, 0.0 }
 0x690   : > { %v1119_v12 = vadd.f32 %v1118_v11, %v1117_v10 }
 0x692   : > { %1120 = vadd.xlane.f32.xlu0 %v1119_v12 }
 0x693   : > { %1479 = shalt.err (!%p1476_p3)
}
 0x694   : > { %s1480_s22 = scalar_lea.hbm %s1836_s29, 32  ;;  %s1484_s1 = scalar_lea.hbm %s1917_s14, 64 }
 0x695   : > { %p1481_p4 = scmp.ne.s32.totalorder %s1836_s29, %s1480_s22  ;;  %p1485_p9 = scmp.lt.u32.totalorder %s1836_s29, %s1917_s14 }
 0x696   : > { %p1486_p10 = scmp.lt.u32.totalorder %s1484_s1, %s1480_s22  ;;  %p1488_p12 = scmp.lt.u32.totalorder %s1480_s22, %s1836_s29 }
 0x697   : > { %p1482_p7 = pnand %p1481_p4, %p1705_p5 }
 0x698   : > { %p1487_p11 = por %p1486_p10, %p1485_p9 }
 0x699   : > { %p1483_p8 = pneg %p1482_p7 }
 0x69a   : > { %p1489_p13 = por %p1488_p12, %p1487_p11 }
 0x69c   : > { %p1490_p0 = pnand %p1489_p13, %p1483_p8 }
 0x69e   : > { %1493 = shalt.err (!%p1490_p0)
}
 0x69f   : > { %1398 = dma.vmem_to_hbm [thread:$0]  (%p1705_p5), %s1151_s30, 32, %s1836_s29, %s1127_s5  }
 0x6a0   : > { %s1346_s3 = sshll.u32 %s1688_s9, 6  ;;  %s1164_s25 = sshll.u32 %s1822_s28, 4  ;;  %s1165_s25 = int_to_ptr.vmem [resolvable:$true] %s1164_s25 }
 0x6a1   : > { %s1861_s19 = scalar_lea.hbm %s1918_s15, %s1346_s3  ;;  %s1132_s22 = scalar_lea.sflag [#allocation6], %s1807_s27 }
 0x6a2   : > { %s1494_s1 = scalar_lea.vmem %s1165_s25, 64  ;;  %s1578_s2 = smov [#allocation5]  }
 0x6a3   : > { %p1495_p1 = scmp.ne.s32.totalorder %s1165_s25, %s1494_s1  ;;  %s1498_s4 = sshll.u32 %s1578_s2, 4  ;;  %s1499_s4 = int_to_ptr.vmem [resolvable:$false] %s1498_s4 }
 0x6a4   : > { %s1500_s6 = scalar_lea.vmem %s1499_s4, 128  ;;  %p1501_p4 = scmp.lt.s32.totalorder %s1165_s25, %s1499_s4 }
 0x6a5   : > { %p1496_p2 = pnand %p1495_p1, %p1705_p5  ;;  %p1502_p7 = scmp.lt.s32.totalorder %s1500_s6, %s1494_s1 }
 0x6a7   : > { %p1497_p3 = pneg %p1496_p2  ;;  %p1503_p8 = por %p1502_p7, %p1501_p4 }
 0x6a9   : > { %p1504_p9 = pnand %p1503_p8, %p1497_p3 }
 0x6ab   : > { %1507 = shalt.err (!%p1504_p9)
}
 0x6ac   : > { %s1508_s9 = scalar_lea.hbm %s1861_s19, 64  ;;  %s1512_s30 = scalar_lea.hbm %s1918_s15, 128 }
 0x6ad   : > { %p1509_p10 = scmp.ne.s32.totalorder %s1861_s19, %s1508_s9  ;;  %p1513_p13 = scmp.lt.u32.totalorder %s1861_s19, %s1918_s15 }
 0x6ae   : > { %p1514_p0 = scmp.lt.u32.totalorder %s1512_s30, %s1508_s9  ;;  %p1516_p2 = scmp.lt.u32.totalorder %s1508_s9, %s1861_s19 }
 0x6af   : > { %p1510_p11 = pnand %p1509_p10, %p1705_p5 }
 0x6b0   : > { %p1515_p1 = por %p1514_p0, %p1513_p13 }
 0x6b1   : > { %p1511_p12 = pneg %p1510_p11 }
 0x6b2   : > { %p1517_p3 = por %p1516_p2, %p1515_p1 }
 0x6b4   : > { %p1518_p4 = pnand %p1517_p3, %p1511_p12 }
 0x6b6   : > { %1521 = shalt.err (!%p1518_p4)
}
 0x6b7   : > { %1399 = dma.vmem_to_hbm [thread:$0]  (%p1705_p5), %s1165_s25, 64, %s1861_s19, %s1132_s22   ;;  %vm1122_vm14 = vcmask 7168   ;;  %vm1124_vm15 = vcmask 11264  }
 0x6b8   : > { %s1318_s6 = sshll.u32 %s1722_s21, 2 }
 0x6b9   : > { %s582_s0 = scalar_lea.vmem %s1919_s16, %s1318_s6 }
 0x71f   : > { %v1121_v13 = vpop.xlane.xlu0 %1120 }
 0x720   : > { %v1123_v14 = vsel %vm1122_vm14, %v1825_v5, %v1121_v13 }
 0x721   : > { %1125 = vst.msk [vmem:[%s582_s0] sm:$0xf] %vm1124_vm15, %v1123_v14 }
 0x722 PF: > { %p1409_p7 = scmp.ge.s32.totalorder %s1560_s26, 2  ;;  %s1179_s17 = sand.u32 1, %s1548_s23  }
 0x723   : > { %s1180_s25 = scalar_lea.sflag [#allocation4], %s1179_s17 }
 0x724   : > { %p1403_p8 = pnand %p1409_p7, %p1709_p6 }
 0x726   : > { %1539 = dma.done.wait (!%p1403_p8), %s1180_s25, 32  }
 0x727   : > { %1541 = vsyncadd (!%p1403_p8), %s1180_s25, 4294967264  ;;  %s1189_s21 = scalar_lea.sflag [#allocation6], %s1179_s17 }
 0x728   : > { %1543 = dma.done.wait (!%p1403_p8), %s1189_s21, 64  }
 0x729   : > { %1545 = vsyncadd (!%p1403_p8), %s1189_s21, 4294967232  ;;  %s1942_s26 = sld [smem:[#allocation10_spill]]  ;;  %s1943_s20 = sld [smem:[#allocation9_spill]] }
 0x72a   : > { %s1944_s25 = sld [smem:[#allocation11_spill]]  ;;  %s1945_s23 = smov %s1552_s24 }
 0x72f   : > { %p32_p5 = scmp.ge.s32.totalorder %s1942_s26, 4   ;;  %s1946_s24 = smov %s1943_s20 }
 0x731   :  { %34 = sbr.rel (!%p32_p5) target bundleno = 13 (0xd), region = 146 }
 0x738   :  { %1201 = vsyncpa [#allocation4], 1 }
 0x739   :  { %1203 = vsyncpa [#allocation4 + $0x1], 1 }
 0x73a   :  { %1204 = vsyncpa [#allocation6], 1 }
 0x73b   :  { %1206 = vsyncpa [#allocation6 + $0x1], 1 }

</bundles_post_ra>
